<compile_context>
chip_gen: v5e
topology: v5e:2x2
jax: 0.10.0
libtpu: 0.0.40
codegen_flags: <defaults>
</compile_context>

<pallas_src>
import jax
import jax.numpy as jnp
from jax import lax
from jax.experimental import pallas as pl
from jax.experimental.pallas import tpu as pltpu


# ---------------------------------------------------------------------------
# Pallas kernel
# ---------------------------------------------------------------------------
def _gudi_block_kernel(x_ref, side_ref, sw_ref, mask_ref,
                       wg5_ref, b1sc_ref, wg11_ref, b11_ref, wg2_ref, b2_ref,
                       out_ref, x5_ref):
    f32 = jnp.float32
    bf16 = jnp.bfloat16

    Cout = out_ref.shape[1]
    HW = out_ref.shape[2]
    Cp = x_ref.shape[1]            # input channels padded to a multiple of 8
    hu = x_ref.shape[2]            # compact (pre-unpool) rows = ceil(H/2)
    W = sw_ref.shape[1]
    L5 = x5_ref.shape[1]           # HW + 4*W + 4  (5x5 flat guard layout)
    OFF5 = 2 * W + 2               # flat offset of image row 0 in x5 scratch
    OFF3 = W + 1                   # flat guard for the 3x3 stages

    # ---- unpool (stride-2 zero insertion) into the flat padded x scratch ----
    # x comes in compact from HBM; the spread matrix sw (wu, W) zero-interleaves
    # along W with one small matmul, then hu row stores place the even rows.
    x5_ref[...] = jnp.zeros((Cp, L5), bf16)          # single full zero store
    xw = jnp.dot(x_ref[0].reshape(Cp * hu, x_ref.shape[3]), sw_ref[...],
                 preferred_element_type=f32).astype(bf16)
    xw = xw.reshape(Cp, hu, W)
    for a in range(hu):                              # even output rows only
        base = OFF5 + (2 * a) * W
        x5_ref[:, base:base + W] = xw[:, a, :]
    x5 = x5_ref[...]                                 # (Cp, L5) bf16

    # ---- fused conv1 + sc_conv1 (5x5): weights-as-LHS, H*W on lanes ---------
    # Per kw: RHS = 5 lane-shifted slices (one per kh) stacked on sublanes;
    # column mask zeroes reads that wrapped across a row boundary.
    acc = jnp.zeros((2 * Cout, HW), f32)
    for kw in range(5):
        r = jnp.concatenate(
            [x5[:, kh * W + kw:kh * W + kw + HW] for kh in range(5)], axis=0)
        if kw != 2:
            r = r * mask_ref[kw:kw + 1, :]
        acc = acc + jnp.dot(wg5_ref[kw], r, preferred_element_type=f32)
    acc = acc + b1sc_ref[...]
    out1 = jnp.maximum(acc[:Cout], 0.0).astype(bf16)   # relu(bn1(conv1(x)))
    sc = acc[Cout:]                                     # sc_bn1(sc_conv1(x)) f32

    # ---- conv1_1 (3x3) over cat(out1, side) ---------------------------------
    side = side_ref[0]                                  # (Cout, HW) bf16
    zg2 = jnp.zeros((2 * Cout, OFF3), bf16)
    g = jnp.concatenate(
        [zg2, jnp.concatenate([out1, side], axis=0), zg2], axis=1)
    acc = jnp.zeros((Cout, HW), f32)
    for kw in range(3):
        r = jnp.concatenate(
            [g[:, kh * W + kw:kh * W + kw + HW] for kh in range(3)], axis=0)
        if kw != 1:
            r = r * mask_ref[kw + 1:kw + 2, :]
        acc = acc + jnp.dot(wg11_ref[kw], r, preferred_element_type=f32)
    out11 = jnp.maximum(acc + b11_ref[...], 0.0).astype(bf16)

    # ---- bn2(conv2(out11)) (3x3) --------------------------------------------
    zg1 = jnp.zeros((Cout, OFF3), bf16)
    g2 = jnp.concatenate([zg1, out11, zg1], axis=1)
    acc = jnp.zeros((Cout, HW), f32)
    for kw in range(3):
        r = jnp.concatenate(
            [g2[:, kh * W + kw:kh * W + kw + HW] for kh in range(3)], axis=0)
        if kw != 1:
            r = r * mask_ref[kw + 1:kw + 2, :]
        acc = acc + jnp.dot(wg2_ref[kw], r, preferred_element_type=f32)

    # ---- residual add + relu: lane-dense (Cout, H*W) unmasked store ---------
    out_ref[0] = jnp.maximum(acc + b2_ref[...] + sc, 0.0)


# ---------------------------------------------------------------------------
# Wrapper: layout glue, weight grouping (bf16), masks, BlockSpecs
# ---------------------------------------------------------------------------
def gudi_upproj_block_cat(x_nchw, side_nchw, params, oheight=0, owidth=0):
    """x_nchw: (N, Cin, Hin, Win), side_nchw: (N, Cout, H, W).  Returns NCHW."""
    w1, b1, wsc, bsc, w11, b11, w2, b2 = params
    N, Cin, Hin, Win = x_nchw.shape
    Cout = side_nchw.shape[1]
    H = oheight if oheight else 2 * Hin
    W = owidth if owidth else 2 * Win
    if H > 2 * Hin or W > 2 * Win:
        raise ValueError("oheight/owidth must be <= 2x the input spatial size")
    hu, wu = (H + 1) // 2, (W + 1) // 2
    HW = H * W
    L5 = HW + 4 * W + 4
    Cp = ((Cin + 7) // 8) * 8                       # pad Cin to sublane multiple

    # --- grouped / transposed bf16 weights:  [kw, cout, kh*Cin + cin] ---------
    wf = jnp.concatenate([w1, wsc], axis=3)         # (5,5,Cin,2*Cout) HWIO
    if Cp != Cin:
        wf = jnp.pad(wf, ((0, 0), (0, 0), (0, Cp - Cin), (0, 0)))
    wg5 = jnp.transpose(wf, (1, 3, 0, 2)).reshape(5, 2 * Cout, 5 * Cp)
    wg5 = wg5.astype(jnp.bfloat16)
    wg11 = jnp.transpose(w11, (1, 3, 0, 2)).reshape(3, Cout, 3 * 2 * Cout)
    wg11 = wg11.astype(jnp.bfloat16)
    wg2 = jnp.transpose(w2, (1, 3, 0, 2)).reshape(3, Cout, 3 * Cout)
    wg2 = wg2.astype(jnp.bfloat16)

    b1sc = jnp.concatenate([b1, bsc], axis=1).reshape(2 * Cout, 1).astype(jnp.float32)
    b11c = b11.reshape(Cout, 1).astype(jnp.float32)
    b2c = b2.reshape(Cout, 1).astype(jnp.float32)

    # --- unpool spread matrix (W interleave) and column-validity masks --------
    sw = (jnp.arange(W)[None, :] == (2 * jnp.arange(wu))[:, None]).astype(jnp.bfloat16)
    col = jnp.arange(HW, dtype=jnp.int32) % W
    s = jnp.arange(5, dtype=jnp.int32)[:, None] - 2
    mask = ((col[None, :] + s >= 0) & (col[None, :] + s < W)).astype(jnp.bfloat16)

    # --- compact inputs (no zero-inflated x in HBM) ----------------------------
    x_c = x_nchw[:, :, :hu, :wu].astype(jnp.bfloat16)
    if Cp != Cin:
        x_c = jnp.pad(x_c, ((0, 0), (0, Cp - Cin), (0, 0), (0, 0)))
    side_flat = side_nchw.reshape(N, Cout, HW).astype(jnp.bfloat16)

    def wspec(a):
        return pl.BlockSpec(a.shape, lambda n, _nd=a.ndim: (0,) * _nd)

    grid_spec = pltpu.PrefetchScalarGridSpec(
        num_scalar_prefetch=0,
        grid=(N,),
        in_specs=[
            pl.BlockSpec((1, Cp, hu, wu), lambda n: (n, 0, 0, 0)),
            pl.BlockSpec((1, Cout, HW), lambda n: (n, 0, 0)),
            wspec(sw), wspec(mask),
            wspec(wg5), wspec(b1sc), wspec(wg11), wspec(b11c),
            wspec(wg2), wspec(b2c),
        ],
        out_specs=pl.BlockSpec((1, Cout, HW), lambda n: (n, 0, 0)),
        scratch_shapes=[pltpu.VMEM((Cp, L5), jnp.bfloat16)],
    )

    # VMEM budget: double-buffered blocks + resident weights/masks/scratch,
    # with headroom, capped well below v7x's 64 MiB physical VMEM.
    def _nbytes(a):
        return int(a.size) * a.dtype.itemsize
    per_step = (_nbytes(x_c) + _nbytes(side_flat)) // N + Cout * HW * 4
    resident = sum(_nbytes(a) for a in (sw, mask, wg5, b1sc, wg11, b11c, wg2, b2c))
    resident += Cp * L5 * 2
    vmem_limit = int(min(max(3 * per_step + 2 * resident, 16 << 20), 48 << 20))

    out_flat = pl.pallas_call(
        _gudi_block_kernel,
        out_shape=jax.ShapeDtypeStruct((N, Cout, HW), jnp.float32),
        grid_spec=grid_spec,
        compiler_params=pltpu.CompilerParams(
            dimension_semantics=("parallel",),
            vmem_limit_bytes=vmem_limit),
    )(x_c, side_flat, sw, mask, wg5, b1sc, wg11, b11c, wg2, b2c)

    # Lane-dense flat NCHW out of the kernel; this reshape is free (contiguous).
    return out_flat.reshape(N, Cout, H, W)


# ---------------------------------------------------------------------------
# Parameter construction (deterministic, eval-mode BN folded into conv)
# ---------------------------------------------------------------------------
def _fold_bn(w_hwio, gamma, beta, mean, var, eps=1e-5):
    scale = gamma / jnp.sqrt(var + eps)
    w = w_hwio * scale[None, None, None, :]
    b = beta - mean * scale
    return w.astype(jnp.float32), b.reshape(1, -1).astype(jnp.float32)


def _bn_params(key, c):
    kg, kb, km, kv = jax.random.split(key, 4)
    gamma = 1.0 + 0.1 * jax.random.normal(kg, (c,), jnp.float32)
    beta = 0.1 * jax.random.normal(kb, (c,), jnp.float32)
    mean = 0.1 * jax.random.normal(km, (c,), jnp.float32)
    var = jax.random.uniform(kv, (c,), jnp.float32, 0.5, 1.5)
    return gamma, beta, mean, var


# ---------------------------------------------------------------------------
# Pure-JAX (XLA conv) reference with the same bf16-in / f32-accumulate numerics
# ---------------------------------------------------------------------------
def _reference_forward(x_nchw, side_nchw, params, oheight, owidth):
    w1, b1, wsc, bsc, w11, b11, w2, b2 = params
    N, Cin, Hin, Win = x_nchw.shape
    oh = oheight if oheight else 2 * Hin
    ow = owidth if owidth else 2 * Win

    xu = jnp.zeros((N, Cin, 2 * Hin, 2 * Win), x_nchw.dtype)
    xu = xu.at[:, :, ::2, ::2].set(x_nchw)
    xu = xu[:, :, :oh, :ow]
    xu = jnp.transpose(xu, (0, 2, 3, 1)).astype(jnp.bfloat16)
    side = jnp.transpose(side_nchw, (0, 2, 3, 1)).astype(jnp.bfloat16)

    def conv(x, w, pad):
        return lax.conv_general_dilated(
            x, w.astype(jnp.bfloat16), (1, 1), [(pad, pad), (pad, pad)],
            dimension_numbers=("NHWC", "HWIO", "NHWC"),
            preferred_element_type=jnp.float32)

    out1 = jax.nn.relu(conv(xu, w1, 2) + b1.reshape(1, 1, 1, -1))
    sc = conv(xu, wsc, 2) + bsc.reshape(1, 1, 1, -1)
    cat = jnp.concatenate([out1.astype(jnp.bfloat16), side], axis=-1)
    out11 = jax.nn.relu(conv(cat, w11, 1) + b11.reshape(1, 1, 1, -1))
    out2 = conv(out11.astype(jnp.bfloat16), w2, 1) + b2.reshape(1, 1, 1, -1)
    out = jax.nn.relu(out2 + sc)
    return jnp.transpose(out, (0, 3, 1, 2))


# ---------------------------------------------------------------------------
if __name__ == "__main__":
    N, Cin, Cout = 2, 4, 8
    Hin = Win = 8
    oheight = owidth = 16          # == 2*Hin, 2*Win (crop is a no-op here)

    key = jax.random.PRNGKey(0)
    ks = jax.random.split(key, 12)

    x = jax.random.normal(ks[0], (N, Cin, Hin, Win), jnp.float32)
    side_input = jax.random.normal(ks[1], (N, Cout, oheight, owidth), jnp.float32)

    # conv weights in HWIO (deterministic synthetic init)
    w1_raw = 0.1 * jax.random.normal(ks[2], (5, 5, Cin, Cout), jnp.float32)
    wsc_raw = 0.1 * jax.random.normal(ks[3], (5, 5, Cin, Cout), jnp.float32)
    w11_raw = 0.1 * jax.random.normal(ks[4], (3, 3, 2 * Cout, Cout), jnp.float32)
    w2_raw = 0.1 * jax.random.normal(ks[5], (3, 3, Cout, Cout), jnp.float32)

    w1, b1 = _fold_bn(w1_raw, *_bn_params(ks[6], Cout))
    wsc, bsc = _fold_bn(wsc_raw, *_bn_params(ks[7], Cout))
    w11, b11 = _fold_bn(w11_raw, *_bn_params(ks[8], Cout))
    w2, b2 = _fold_bn(w2_raw, *_bn_params(ks[9], Cout))

    params = (w1, b1, wsc, bsc, w11, b11, w2, b2)

    out = gudi_upproj_block_cat(x, side_input, params, oheight, owidth)
    out = jax.block_until_ready(out)

    ref = jax.block_until_ready(
        _reference_forward(x, side_input, params, oheight, owidth))

    assert out.shape == (N, Cout, oheight, owidth), out.shape
    max_err = float(jnp.max(jnp.abs(out - ref)))
    assert jnp.allclose(out, ref, atol=2e-2, rtol=2e-2), max_err

    print("KERNEL_OK")
</pallas_src>

<mosaic_0001>
module attributes {stable_mosaic.version = 11 : i64} {
  func.func @_gudi_block_kernel(%arg0: i32, %arg1: memref<1x8x8x8xbf16, #tpu.memory_space<vmem>>, %arg2: memref<1x8x256xbf16, #tpu.memory_space<vmem>>, %arg3: memref<8x16xbf16, #tpu.memory_space<vmem>>, %arg4: memref<5x256xbf16, #tpu.memory_space<vmem>>, %arg5: memref<5x16x40xbf16, #tpu.memory_space<vmem>>, %arg6: memref<16x1xf32, #tpu.memory_space<vmem>>, %arg7: memref<3x8x48xbf16, #tpu.memory_space<vmem>>, %arg8: memref<8x1xf32, #tpu.memory_space<vmem>>, %arg9: memref<3x8x24xbf16, #tpu.memory_space<vmem>>, %arg10: memref<8x1xf32, #tpu.memory_space<vmem>>, %arg11: memref<1x8x256xf32, #tpu.memory_space<vmem>>, %arg12: memref<8x324xbf16, #tpu.memory_space<vmem>>) attributes {dimension_semantics = [#tpu.dimension_semantics<parallel>], iteration_bounds = array<i64: 2>, scalar_prefetch = 0 : i64, scratch_operands = 1 : i64, tpu.core_type = #tpu.core_type<tc>, window_params = [{transform_indices = @transform_0, window_bounds = array<i64: 1, 8, 8, 8>}, {transform_indices = @transform_1, window_bounds = array<i64: 1, 8, 256>}, {pipeline_mode = #tpu.pipeline_mode<synchronous>, transform_indices = @transform_2, window_bounds = array<i64: 8, 16>}, {pipeline_mode = #tpu.pipeline_mode<synchronous>, transform_indices = @transform_3, window_bounds = array<i64: 5, 256>}, {pipeline_mode = #tpu.pipeline_mode<synchronous>, transform_indices = @transform_4, window_bounds = array<i64: 5, 16, 40>}, {pipeline_mode = #tpu.pipeline_mode<synchronous>, transform_indices = @transform_5, window_bounds = array<i64: 16, 1>}, {pipeline_mode = #tpu.pipeline_mode<synchronous>, transform_indices = @transform_6, window_bounds = array<i64: 3, 8, 48>}, {pipeline_mode = #tpu.pipeline_mode<synchronous>, transform_indices = @transform_7, window_bounds = array<i64: 8, 1>}, {pipeline_mode = #tpu.pipeline_mode<synchronous>, transform_indices = @transform_8, window_bounds = array<i64: 3, 8, 24>}, {pipeline_mode = #tpu.pipeline_mode<synchronous>, transform_indices = @transform_9, window_bounds = array<i64: 8, 1>}, {transform_indices = @transform_10, window_bounds = array<i64: 1, 8, 256>}]} {
    %cst = arith.constant 0.000000e+00 : bf16
    %0 = vector.broadcast %cst : bf16 to vector<8x324xbf16>
    %c0 = arith.constant 0 : index
    %c0_0 = arith.constant 0 : index
    %1 = vector.load %arg12[%c0, %c0_0] : memref<8x324xbf16, #tpu.memory_space<vmem>>, vector<8x324xbf16>
    tpu.vector_store %arg12[%c0, %c0_0], %0 {strides = array<i32>} : memref<8x324xbf16, #tpu.memory_space<vmem>>, vector<8x324xbf16>,
    %c0_1 = arith.constant 0 : index
    %c0_2 = arith.constant 0 : index
    %c0_3 = arith.constant 0 : index
    %c0_4 = arith.constant 0 : index
    %2 = vector.load %arg1[%c0_1, %c0_2, %c0_3, %c0_4] : memref<1x8x8x8xbf16, #tpu.memory_space<vmem>>, vector<1x8x8x8xbf16>
    %3 = vector.shape_cast %2 : vector<1x8x8x8xbf16> to vector<8x8x8xbf16>
    %4 = vector.shape_cast %3 : vector<8x8x8xbf16> to vector<64x8xbf16>
    %c0_5 = arith.constant 0 : index
    %c0_6 = arith.constant 0 : index
    %5 = vector.load %arg3[%c0_5, %c0_6] : memref<8x16xbf16, #tpu.memory_space<vmem>>, vector<8x16xbf16>
    %cst_7 = arith.constant dense<0.000000e+00> : vector<64x16xf32>
    %6 = tpu.matmul %4, %5, %cst_7 {dimension_numbers = #tpu.dot_dimension_numbers<[1], [0], [0], [1], [0, 0, 1, 1], [], []>} : vector<64x8xbf16>, vector<8x16xbf16>, vector<64x16xf32> -> vector<64x16xf32>
    %7 = arith.truncf %6 : vector<64x16xf32> to vector<64x16xbf16>
    %8 = vector.shape_cast %7 : vector<64x16xbf16> to vector<8x8x16xbf16>
    %9 = vector.extract_strided_slice %8 {offsets = [0, 0, 0], sizes = [8, 1, 16], strides = [1, 1, 1]} : vector<8x8x16xbf16> to vector<8x1x16xbf16>
    %10 = vector.shape_cast %9 : vector<8x1x16xbf16> to vector<8x16xbf16>
    %c0_8 = arith.constant 0 : index
    %c34 = arith.constant 34 : index
    %11 = vector.load %arg12[%c0_8, %c34] : memref<8x324xbf16, #tpu.memory_space<vmem>>, vector<8x16xbf16>
    tpu.vector_store %arg12[%c0_8, %c34], %10 {strides = array<i32>} : memref<8x324xbf16, #tpu.memory_space<vmem>>, vector<8x16xbf16>,
    %12 = vector.extract_strided_slice %8 {offsets = [0, 1, 0], sizes = [8, 1, 16], strides = [1, 1, 1]} : vector<8x8x16xbf16> to vector<8x1x16xbf16>
    %13 = vector.shape_cast %12 : vector<8x1x16xbf16> to vector<8x16xbf16>
    %c0_9 = arith.constant 0 : index
    %c66 = arith.constant 66 : index
    %14 = vector.load %arg12[%c0_9, %c66] : memref<8x324xbf16, #tpu.memory_space<vmem>>, vector<8x16xbf16>
    tpu.vector_store %arg12[%c0_9, %c66], %13 {strides = array<i32>} : memref<8x324xbf16, #tpu.memory_space<vmem>>, vector<8x16xbf16>,
    %15 = vector.extract_strided_slice %8 {offsets = [0, 2, 0], sizes = [8, 1, 16], strides = [1, 1, 1]} : vector<8x8x16xbf16> to vector<8x1x16xbf16>
    %16 = vector.shape_cast %15 : vector<8x1x16xbf16> to vector<8x16xbf16>
    %c0_10 = arith.constant 0 : index
    %c98 = arith.constant 98 : index
    %17 = vector.load %arg12[%c0_10, %c98] : memref<8x324xbf16, #tpu.memory_space<vmem>>, vector<8x16xbf16>
    tpu.vector_store %arg12[%c0_10, %c98], %16 {strides = array<i32>} : memref<8x324xbf16, #tpu.memory_space<vmem>>, vector<8x16xbf16>,
    %18 = vector.extract_strided_slice %8 {offsets = [0, 3, 0], sizes = [8, 1, 16], strides = [1, 1, 1]} : vector<8x8x16xbf16> to vector<8x1x16xbf16>
    %19 = vector.shape_cast %18 : vector<8x1x16xbf16> to vector<8x16xbf16>
    %c0_11 = arith.constant 0 : index
    %c130 = arith.constant 130 : index
    %20 = vector.load %arg12[%c0_11, %c130] : memref<8x324xbf16, #tpu.memory_space<vmem>>, vector<8x16xbf16>
    tpu.vector_store %arg12[%c0_11, %c130], %19 {strides = array<i32>} : memref<8x324xbf16, #tpu.memory_space<vmem>>, vector<8x16xbf16>,
    %21 = vector.extract_strided_slice %8 {offsets = [0, 4, 0], sizes = [8, 1, 16], strides = [1, 1, 1]} : vector<8x8x16xbf16> to vector<8x1x16xbf16>
    %22 = vector.shape_cast %21 : vector<8x1x16xbf16> to vector<8x16xbf16>
    %c0_12 = arith.constant 0 : index
    %c162 = arith.constant 162 : index
    %23 = vector.load %arg12[%c0_12, %c162] : memref<8x324xbf16, #tpu.memory_space<vmem>>, vector<8x16xbf16>
    tpu.vector_store %arg12[%c0_12, %c162], %22 {strides = array<i32>} : memref<8x324xbf16, #tpu.memory_space<vmem>>, vector<8x16xbf16>,
    %24 = vector.extract_strided_slice %8 {offsets = [0, 5, 0], sizes = [8, 1, 16], strides = [1, 1, 1]} : vector<8x8x16xbf16> to vector<8x1x16xbf16>
    %25 = vector.shape_cast %24 : vector<8x1x16xbf16> to vector<8x16xbf16>
    %c0_13 = arith.constant 0 : index
    %c194 = arith.constant 194 : index
    %26 = vector.load %arg12[%c0_13, %c194] : memref<8x324xbf16, #tpu.memory_space<vmem>>, vector<8x16xbf16>
    tpu.vector_store %arg12[%c0_13, %c194], %25 {strides = array<i32>} : memref<8x324xbf16, #tpu.memory_space<vmem>>, vector<8x16xbf16>,
    %27 = vector.extract_strided_slice %8 {offsets = [0, 6, 0], sizes = [8, 1, 16], strides = [1, 1, 1]} : vector<8x8x16xbf16> to vector<8x1x16xbf16>
    %28 = vector.shape_cast %27 : vector<8x1x16xbf16> to vector<8x16xbf16>
    %c0_14 = arith.constant 0 : index
    %c226 = arith.constant 226 : index
    %29 = vector.load %arg12[%c0_14, %c226] : memref<8x324xbf16, #tpu.memory_space<vmem>>, vector<8x16xbf16>
    tpu.vector_store %arg12[%c0_14, %c226], %28 {strides = array<i32>} : memref<8x324xbf16, #tpu.memory_space<vmem>>, vector<8x16xbf16>,
    %30 = vector.extract_strided_slice %8 {offsets = [0, 7, 0], sizes = [8, 1, 16], strides = [1, 1, 1]} : vector<8x8x16xbf16> to vector<8x1x16xbf16>
    %31 = vector.shape_cast %30 : vector<8x1x16xbf16> to vector<8x16xbf16>
    %c0_15 = arith.constant 0 : index
    %c258 = arith.constant 258 : index
    %32 = vector.load %arg12[%c0_15, %c258] : memref<8x324xbf16, #tpu.memory_space<vmem>>, vector<8x16xbf16>
    tpu.vector_store %arg12[%c0_15, %c258], %31 {strides = array<i32>} : memref<8x324xbf16, #tpu.memory_space<vmem>>, vector<8x16xbf16>,
    %c0_16 = arith.constant 0 : index
    %c0_17 = arith.constant 0 : index
    %33 = vector.load %arg12[%c0_16, %c0_17] : memref<8x324xbf16, #tpu.memory_space<vmem>>, vector<8x324xbf16>
    %cst_18 = arith.constant 0.000000e+00 : f32
    %34 = vector.broadcast %cst_18 : f32 to vector<16x256xf32>
    %35 = vector.extract_strided_slice %33 {offsets = [0, 0], sizes = [8, 256], strides = [1, 1]} : vector<8x324xbf16> to vector<8x256xbf16>
    %36 = vector.extract_strided_slice %33 {offsets = [0, 16], sizes = [8, 256], strides = [1, 1]} : vector<8x324xbf16> to vector<8x256xbf16>
    %37 = vector.extract_strided_slice %33 {offsets = [0, 32], sizes = [8, 256], strides = [1, 1]} : vector<8x324xbf16> to vector<8x256xbf16>
    %38 = vector.extract_strided_slice %33 {offsets = [0, 48], sizes = [8, 256], strides = [1, 1]} : vector<8x324xbf16> to vector<8x256xbf16>
    %39 = vector.extract_strided_slice %33 {offsets = [0, 64], sizes = [8, 256], strides = [1, 1]} : vector<8x324xbf16> to vector<8x256xbf16>
    %40 = tpu.concatenate %35, %36, %37, %38, %39 in 0 : vector<8x256xbf16>, vector<8x256xbf16>, vector<8x256xbf16>, vector<8x256xbf16>, vector<8x256xbf16> -> vector<40x256xbf16>
    %c0_19 = arith.constant 0 : index
    %c0_20 = arith.constant 0 : index
    %41 = vector.load %arg4[%c0_19, %c0_20] : memref<5x256xbf16, #tpu.memory_space<vmem>>, vector<1x256xbf16>
    %42 = vector.broadcast %41 : vector<1x256xbf16> to vector<40x256xbf16>
    %43 = arith.mulf %40, %42 : vector<40x256xbf16>
    %c0_21 = arith.constant 0 : index
    %c0_22 = arith.constant 0 : index
    %c0_23 = arith.constant 0 : index
    %44 = vector.load %arg5[%c0_21, %c0_22, %c0_23] : memref<5x16x40xbf16, #tpu.memory_space<vmem>>, vector<1x16x40xbf16>
    %45 = vector.shape_cast %44 : vector<1x16x40xbf16> to vector<16x40xbf16>
    %cst_24 = arith.constant dense<0.000000e+00> : vector<16x256xf32>
    %46 = tpu.matmul %45, %43, %cst_24 {dimension_numbers = #tpu.dot_dimension_numbers<[1], [0], [0], [1], [0, 0, 1, 1], [], []>} : vector<16x40xbf16>, vector<40x256xbf16>, vector<16x256xf32> -> vector<16x256xf32>
    %47 = arith.addf %34, %46 : vector<16x256xf32>
    %48 = vector.extract_strided_slice %33 {offsets = [0, 1], sizes = [8, 256], strides = [1, 1]} : vector<8x324xbf16> to vector<8x256xbf16>
    %49 = vector.extract_strided_slice %33 {offsets = [0, 17], sizes = [8, 256], strides = [1, 1]} : vector<8x324xbf16> to vector<8x256xbf16>
    %50 = vector.extract_strided_slice %33 {offsets = [0, 33], sizes = [8, 256], strides = [1, 1]} : vector<8x324xbf16> to vector<8x256xbf16>
    %51 = vector.extract_strided_slice %33 {offsets = [0, 49], sizes = [8, 256], strides = [1, 1]} : vector<8x324xbf16> to vector<8x256xbf16>
    %52 = vector.extract_strided_slice %33 {offsets = [0, 65], sizes = [8, 256], strides = [1, 1]} : vector<8x324xbf16> to vector<8x256xbf16>
    %53 = tpu.concatenate %48, %49, %50, %51, %52 in 0 : vector<8x256xbf16>, vector<8x256xbf16>, vector<8x256xbf16>, vector<8x256xbf16>, vector<8x256xbf16> -> vector<40x256xbf16>
    %c1 = arith.constant 1 : index
    %c0_25 = arith.constant 0 : index
    %54 = vector.load %arg4[%c1, %c0_25] : memref<5x256xbf16, #tpu.memory_space<vmem>>, vector<1x256xbf16>
    %55 = vector.broadcast %54 : vector<1x256xbf16> to vector<40x256xbf16>
    %56 = arith.mulf %53, %55 : vector<40x256xbf16>
    %c1_26 = arith.constant 1 : index
    %c0_27 = arith.constant 0 : index
    %c0_28 = arith.constant 0 : index
    %57 = vector.load %arg5[%c1_26, %c0_27, %c0_28] : memref<5x16x40xbf16, #tpu.memory_space<vmem>>, vector<1x16x40xbf16>
    %58 = vector.shape_cast %57 : vector<1x16x40xbf16> to vector<16x40xbf16>
    %cst_29 = arith.constant dense<0.000000e+00> : vector<16x256xf32>
    %59 = tpu.matmul %58, %56, %cst_29 {dimension_numbers = #tpu.dot_dimension_numbers<[1], [0], [0], [1], [0, 0, 1, 1], [], []>} : vector<16x40xbf16>, vector<40x256xbf16>, vector<16x256xf32> -> vector<16x256xf32>
    %60 = arith.addf %47, %59 : vector<16x256xf32>
    %61 = vector.extract_strided_slice %33 {offsets = [0, 2], sizes = [8, 256], strides = [1, 1]} : vector<8x324xbf16> to vector<8x256xbf16>
    %62 = vector.extract_strided_slice %33 {offsets = [0, 18], sizes = [8, 256], strides = [1, 1]} : vector<8x324xbf16> to vector<8x256xbf16>
    %63 = vector.extract_strided_slice %33 {offsets = [0, 34], sizes = [8, 256], strides = [1, 1]} : vector<8x324xbf16> to vector<8x256xbf16>
    %64 = vector.extract_strided_slice %33 {offsets = [0, 50], sizes = [8, 256], strides = [1, 1]} : vector<8x324xbf16> to vector<8x256xbf16>
    %65 = vector.extract_strided_slice %33 {offsets = [0, 66], sizes = [8, 256], strides = [1, 1]} : vector<8x324xbf16> to vector<8x256xbf16>
    %66 = tpu.concatenate %61, %62, %63, %64, %65 in 0 : vector<8x256xbf16>, vector<8x256xbf16>, vector<8x256xbf16>, vector<8x256xbf16>, vector<8x256xbf16> -> vector<40x256xbf16>
    %c2 = arith.constant 2 : index
    %c0_30 = arith.constant 0 : index
    %c0_31 = arith.constant 0 : index
    %67 = vector.load %arg5[%c2, %c0_30, %c0_31] : memref<5x16x40xbf16, #tpu.memory_space<vmem>>, vector<1x16x40xbf16>
    %68 = vector.shape_cast %67 : vector<1x16x40xbf16> to vector<16x40xbf16>
    %cst_32 = arith.constant dense<0.000000e+00> : vector<16x256xf32>
    %69 = tpu.matmul %68, %66, %cst_32 {dimension_numbers = #tpu.dot_dimension_numbers<[1], [0], [0], [1], [0, 0, 1, 1], [], []>} : vector<16x40xbf16>, vector<40x256xbf16>, vector<16x256xf32> -> vector<16x256xf32>
    %70 = arith.addf %60, %69 : vector<16x256xf32>
    %71 = vector.extract_strided_slice %33 {offsets = [0, 3], sizes = [8, 256], strides = [1, 1]} : vector<8x324xbf16> to vector<8x256xbf16>
    %72 = vector.extract_strided_slice %33 {offsets = [0, 19], sizes = [8, 256], strides = [1, 1]} : vector<8x324xbf16> to vector<8x256xbf16>
    %73 = vector.extract_strided_slice %33 {offsets = [0, 35], sizes = [8, 256], strides = [1, 1]} : vector<8x324xbf16> to vector<8x256xbf16>
    %74 = vector.extract_strided_slice %33 {offsets = [0, 51], sizes = [8, 256], strides = [1, 1]} : vector<8x324xbf16> to vector<8x256xbf16>
    %75 = vector.extract_strided_slice %33 {offsets = [0, 67], sizes = [8, 256], strides = [1, 1]} : vector<8x324xbf16> to vector<8x256xbf16>
    %76 = tpu.concatenate %71, %72, %73, %74, %75 in 0 : vector<8x256xbf16>, vector<8x256xbf16>, vector<8x256xbf16>, vector<8x256xbf16>, vector<8x256xbf16> -> vector<40x256xbf16>
    %c3 = arith.constant 3 : index
    %c0_33 = arith.constant 0 : index
    %77 = vector.load %arg4[%c3, %c0_33] : memref<5x256xbf16, #tpu.memory_space<vmem>>, vector<1x256xbf16>
    %78 = vector.broadcast %77 : vector<1x256xbf16> to vector<40x256xbf16>
    %79 = arith.mulf %76, %78 : vector<40x256xbf16>
    %c3_34 = arith.constant 3 : index
    %c0_35 = arith.constant 0 : index
    %c0_36 = arith.constant 0 : index
    %80 = vector.load %arg5[%c3_34, %c0_35, %c0_36] : memref<5x16x40xbf16, #tpu.memory_space<vmem>>, vector<1x16x40xbf16>
    %81 = vector.shape_cast %80 : vector<1x16x40xbf16> to vector<16x40xbf16>
    %cst_37 = arith.constant dense<0.000000e+00> : vector<16x256xf32>
    %82 = tpu.matmul %81, %79, %cst_37 {dimension_numbers = #tpu.dot_dimension_numbers<[1], [0], [0], [1], [0, 0, 1, 1], [], []>} : vector<16x40xbf16>, vector<40x256xbf16>, vector<16x256xf32> -> vector<16x256xf32>
    %83 = arith.addf %70, %82 : vector<16x256xf32>
    %84 = vector.extract_strided_slice %33 {offsets = [0, 4], sizes = [8, 256], strides = [1, 1]} : vector<8x324xbf16> to vector<8x256xbf16>
    %85 = vector.extract_strided_slice %33 {offsets = [0, 20], sizes = [8, 256], strides = [1, 1]} : vector<8x324xbf16> to vector<8x256xbf16>
    %86 = vector.extract_strided_slice %33 {offsets = [0, 36], sizes = [8, 256], strides = [1, 1]} : vector<8x324xbf16> to vector<8x256xbf16>
    %87 = vector.extract_strided_slice %33 {offsets = [0, 52], sizes = [8, 256], strides = [1, 1]} : vector<8x324xbf16> to vector<8x256xbf16>
    %88 = vector.extract_strided_slice %33 {offsets = [0, 68], sizes = [8, 256], strides = [1, 1]} : vector<8x324xbf16> to vector<8x256xbf16>
    %89 = tpu.concatenate %84, %85, %86, %87, %88 in 0 : vector<8x256xbf16>, vector<8x256xbf16>, vector<8x256xbf16>, vector<8x256xbf16>, vector<8x256xbf16> -> vector<40x256xbf16>
    %c4 = arith.constant 4 : index
    %c0_38 = arith.constant 0 : index
    %90 = vector.load %arg4[%c4, %c0_38] : memref<5x256xbf16, #tpu.memory_space<vmem>>, vector<1x256xbf16>
    %91 = vector.broadcast %90 : vector<1x256xbf16> to vector<40x256xbf16>
    %92 = arith.mulf %89, %91 : vector<40x256xbf16>
    %c4_39 = arith.constant 4 : index
    %c0_40 = arith.constant 0 : index
    %c0_41 = arith.constant 0 : index
    %93 = vector.load %arg5[%c4_39, %c0_40, %c0_41] : memref<5x16x40xbf16, #tpu.memory_space<vmem>>, vector<1x16x40xbf16>
    %94 = vector.shape_cast %93 : vector<1x16x40xbf16> to vector<16x40xbf16>
    %cst_42 = arith.constant dense<0.000000e+00> : vector<16x256xf32>
    %95 = tpu.matmul %94, %92, %cst_42 {dimension_numbers = #tpu.dot_dimension_numbers<[1], [0], [0], [1], [0, 0, 1, 1], [], []>} : vector<16x40xbf16>, vector<40x256xbf16>, vector<16x256xf32> -> vector<16x256xf32>
    %96 = arith.addf %83, %95 : vector<16x256xf32>
    %c0_43 = arith.constant 0 : index
    %c0_44 = arith.constant 0 : index
    %97 = vector.load %arg6[%c0_43, %c0_44] : memref<16x1xf32, #tpu.memory_space<vmem>>, vector<16x1xf32>
    %98 = vector.broadcast %97 : vector<16x1xf32> to vector<16x256xf32>
    %99 = arith.addf %96, %98 : vector<16x256xf32>
    %100 = vector.extract_strided_slice %99 {offsets = [0, 0], sizes = [8, 256], strides = [1, 1]} : vector<16x256xf32> to vector<8x256xf32>
    %cst_45 = arith.constant 0.000000e+00 : f32
    %101 = vector.broadcast %cst_45 : f32 to vector<8x256xf32>
    %102 = arith.maximumf %100, %101 : vector<8x256xf32>
    %103 = arith.truncf %102 : vector<8x256xf32> to vector<8x256xbf16>
    %104 = vector.extract_strided_slice %99 {offsets = [8, 0], sizes = [8, 256], strides = [1, 1]} : vector<16x256xf32> to vector<8x256xf32>
    %c0_46 = arith.constant 0 : index
    %c0_47 = arith.constant 0 : index
    %c0_48 = arith.constant 0 : index
    %105 = vector.load %arg2[%c0_46, %c0_47, %c0_48] : memref<1x8x256xbf16, #tpu.memory_space<vmem>>, vector<1x8x256xbf16>
    %106 = vector.shape_cast %105 : vector<1x8x256xbf16> to vector<8x256xbf16>
    %cst_49 = arith.constant 0.000000e+00 : bf16
    %107 = vector.broadcast %cst_49 : bf16 to vector<16x17xbf16>
    %108 = tpu.concatenate %103, %106 in 0 : vector<8x256xbf16>, vector<8x256xbf16> -> vector<16x256xbf16>
    %109 = tpu.concatenate %107, %108, %107 in 1 : vector<16x17xbf16>, vector<16x256xbf16>, vector<16x17xbf16> -> vector<16x290xbf16>
    %cst_50 = arith.constant 0.000000e+00 : f32
    %110 = vector.broadcast %cst_50 : f32 to vector<8x256xf32>
    %111 = vector.extract_strided_slice %109 {offsets = [0, 0], sizes = [16, 256], strides = [1, 1]} : vector<16x290xbf16> to vector<16x256xbf16>
    %112 = vector.extract_strided_slice %109 {offsets = [0, 16], sizes = [16, 256], strides = [1, 1]} : vector<16x290xbf16> to vector<16x256xbf16>
    %113 = vector.extract_strided_slice %109 {offsets = [0, 32], sizes = [16, 256], strides = [1, 1]} : vector<16x290xbf16> to vector<16x256xbf16>
    %114 = tpu.concatenate %111, %112, %113 in 0 : vector<16x256xbf16>, vector<16x256xbf16>, vector<16x256xbf16> -> vector<48x256xbf16>
    %c1_51 = arith.constant 1 : index
    %c0_52 = arith.constant 0 : index
    %115 = vector.load %arg4[%c1_51, %c0_52] : memref<5x256xbf16, #tpu.memory_space<vmem>>, vector<1x256xbf16>
    %116 = vector.broadcast %115 : vector<1x256xbf16> to vector<48x256xbf16>
    %117 = arith.mulf %114, %116 : vector<48x256xbf16>
    %c0_53 = arith.constant 0 : index
    %c0_54 = arith.constant 0 : index
    %c0_55 = arith.constant 0 : index
    %118 = vector.load %arg7[%c0_53, %c0_54, %c0_55] : memref<3x8x48xbf16, #tpu.memory_space<vmem>>, vector<1x8x48xbf16>
    %119 = vector.shape_cast %118 : vector<1x8x48xbf16> to vector<8x48xbf16>
    %cst_56 = arith.constant dense<0.000000e+00> : vector<8x256xf32>
    %120 = tpu.matmul %119, %117, %cst_56 {dimension_numbers = #tpu.dot_dimension_numbers<[1], [0], [0], [1], [0, 0, 1, 1], [], []>} : vector<8x48xbf16>, vector<48x256xbf16>, vector<8x256xf32> -> vector<8x256xf32>
    %121 = arith.addf %110, %120 : vector<8x256xf32>
    %122 = vector.extract_strided_slice %109 {offsets = [0, 1], sizes = [16, 256], strides = [1, 1]} : vector<16x290xbf16> to vector<16x256xbf16>
    %123 = vector.extract_strided_slice %109 {offsets = [0, 17], sizes = [16, 256], strides = [1, 1]} : vector<16x290xbf16> to vector<16x256xbf16>
    %124 = vector.extract_strided_slice %109 {offsets = [0, 33], sizes = [16, 256], strides = [1, 1]} : vector<16x290xbf16> to vector<16x256xbf16>
    %125 = tpu.concatenate %122, %123, %124 in 0 : vector<16x256xbf16>, vector<16x256xbf16>, vector<16x256xbf16> -> vector<48x256xbf16>
    %c1_57 = arith.constant 1 : index
    %c0_58 = arith.constant 0 : index
    %c0_59 = arith.constant 0 : index
    %126 = vector.load %arg7[%c1_57, %c0_58, %c0_59] : memref<3x8x48xbf16, #tpu.memory_space<vmem>>, vector<1x8x48xbf16>
    %127 = vector.shape_cast %126 : vector<1x8x48xbf16> to vector<8x48xbf16>
    %cst_60 = arith.constant dense<0.000000e+00> : vector<8x256xf32>
    %128 = tpu.matmul %127, %125, %cst_60 {dimension_numbers = #tpu.dot_dimension_numbers<[1], [0], [0], [1], [0, 0, 1, 1], [], []>} : vector<8x48xbf16>, vector<48x256xbf16>, vector<8x256xf32> -> vector<8x256xf32>
    %129 = arith.addf %121, %128 : vector<8x256xf32>
    %130 = vector.extract_strided_slice %109 {offsets = [0, 2], sizes = [16, 256], strides = [1, 1]} : vector<16x290xbf16> to vector<16x256xbf16>
    %131 = vector.extract_strided_slice %109 {offsets = [0, 18], sizes = [16, 256], strides = [1, 1]} : vector<16x290xbf16> to vector<16x256xbf16>
    %132 = vector.extract_strided_slice %109 {offsets = [0, 34], sizes = [16, 256], strides = [1, 1]} : vector<16x290xbf16> to vector<16x256xbf16>
    %133 = tpu.concatenate %130, %131, %132 in 0 : vector<16x256xbf16>, vector<16x256xbf16>, vector<16x256xbf16> -> vector<48x256xbf16>
    %c3_61 = arith.constant 3 : index
    %c0_62 = arith.constant 0 : index
    %134 = vector.load %arg4[%c3_61, %c0_62] : memref<5x256xbf16, #tpu.memory_space<vmem>>, vector<1x256xbf16>
    %135 = vector.broadcast %134 : vector<1x256xbf16> to vector<48x256xbf16>
    %136 = arith.mulf %133, %135 : vector<48x256xbf16>
    %c2_63 = arith.constant 2 : index
    %c0_64 = arith.constant 0 : index
    %c0_65 = arith.constant 0 : index
    %137 = vector.load %arg7[%c2_63, %c0_64, %c0_65] : memref<3x8x48xbf16, #tpu.memory_space<vmem>>, vector<1x8x48xbf16>
    %138 = vector.shape_cast %137 : vector<1x8x48xbf16> to vector<8x48xbf16>
    %cst_66 = arith.constant dense<0.000000e+00> : vector<8x256xf32>
    %139 = tpu.matmul %138, %136, %cst_66 {dimension_numbers = #tpu.dot_dimension_numbers<[1], [0], [0], [1], [0, 0, 1, 1], [], []>} : vector<8x48xbf16>, vector<48x256xbf16>, vector<8x256xf32> -> vector<8x256xf32>
    %140 = arith.addf %129, %139 : vector<8x256xf32>
    %c0_67 = arith.constant 0 : index
    %c0_68 = arith.constant 0 : index
    %141 = vector.load %arg8[%c0_67, %c0_68] : memref<8x1xf32, #tpu.memory_space<vmem>>, vector<8x1xf32>
    %142 = vector.broadcast %141 : vector<8x1xf32> to vector<8x256xf32>
    %143 = arith.addf %140, %142 : vector<8x256xf32>
    %cst_69 = arith.constant 0.000000e+00 : f32
    %144 = vector.broadcast %cst_69 : f32 to vector<8x256xf32>
    %145 = arith.maximumf %143, %144 : vector<8x256xf32>
    %146 = arith.truncf %145 : vector<8x256xf32> to vector<8x256xbf16>
    %cst_70 = arith.constant 0.000000e+00 : bf16
    %147 = vector.broadcast %cst_70 : bf16 to vector<8x17xbf16>
    %148 = tpu.concatenate %147, %146, %147 in 1 : vector<8x17xbf16>, vector<8x256xbf16>, vector<8x17xbf16> -> vector<8x290xbf16>
    %cst_71 = arith.constant 0.000000e+00 : f32
    %149 = vector.broadcast %cst_71 : f32 to vector<8x256xf32>
    %150 = vector.extract_strided_slice %148 {offsets = [0, 0], sizes = [8, 256], strides = [1, 1]} : vector<8x290xbf16> to vector<8x256xbf16>
    %151 = vector.extract_strided_slice %148 {offsets = [0, 16], sizes = [8, 256], strides = [1, 1]} : vector<8x290xbf16> to vector<8x256xbf16>
    %152 = vector.extract_strided_slice %148 {offsets = [0, 32], sizes = [8, 256], strides = [1, 1]} : vector<8x290xbf16> to vector<8x256xbf16>
    %153 = tpu.concatenate %150, %151, %152 in 0 : vector<8x256xbf16>, vector<8x256xbf16>, vector<8x256xbf16> -> vector<24x256xbf16>
    %c1_72 = arith.constant 1 : index
    %c0_73 = arith.constant 0 : index
    %154 = vector.load %arg4[%c1_72, %c0_73] : memref<5x256xbf16, #tpu.memory_space<vmem>>, vector<1x256xbf16>
    %155 = vector.broadcast %154 : vector<1x256xbf16> to vector<24x256xbf16>
    %156 = arith.mulf %153, %155 : vector<24x256xbf16>
    %c0_74 = arith.constant 0 : index
    %c0_75 = arith.constant 0 : index
    %c0_76 = arith.constant 0 : index
    %157 = vector.load %arg9[%c0_74, %c0_75, %c0_76] : memref<3x8x24xbf16, #tpu.memory_space<vmem>>, vector<1x8x24xbf16>
    %158 = vector.shape_cast %157 : vector<1x8x24xbf16> to vector<8x24xbf16>
    %cst_77 = arith.constant dense<0.000000e+00> : vector<8x256xf32>
    %159 = tpu.matmul %158, %156, %cst_77 {dimension_numbers = #tpu.dot_dimension_numbers<[1], [0], [0], [1], [0, 0, 1, 1], [], []>} : vector<8x24xbf16>, vector<24x256xbf16>, vector<8x256xf32> -> vector<8x256xf32>
    %160 = arith.addf %149, %159 : vector<8x256xf32>
    %161 = vector.extract_strided_slice %148 {offsets = [0, 1], sizes = [8, 256], strides = [1, 1]} : vector<8x290xbf16> to vector<8x256xbf16>
    %162 = vector.extract_strided_slice %148 {offsets = [0, 17], sizes = [8, 256], strides = [1, 1]} : vector<8x290xbf16> to vector<8x256xbf16>
    %163 = vector.extract_strided_slice %148 {offsets = [0, 33], sizes = [8, 256], strides = [1, 1]} : vector<8x290xbf16> to vector<8x256xbf16>
    %164 = tpu.concatenate %161, %162, %163 in 0 : vector<8x256xbf16>, vector<8x256xbf16>, vector<8x256xbf16> -> vector<24x256xbf16>
    %c1_78 = arith.constant 1 : index
    %c0_79 = arith.constant 0 : index
    %c0_80 = arith.constant 0 : index
    %165 = vector.load %arg9[%c1_78, %c0_79, %c0_80] : memref<3x8x24xbf16, #tpu.memory_space<vmem>>, vector<1x8x24xbf16>
    %166 = vector.shape_cast %165 : vector<1x8x24xbf16> to vector<8x24xbf16>
    %cst_81 = arith.constant dense<0.000000e+00> : vector<8x256xf32>
    %167 = tpu.matmul %166, %164, %cst_81 {dimension_numbers = #tpu.dot_dimension_numbers<[1], [0], [0], [1], [0, 0, 1, 1], [], []>} : vector<8x24xbf16>, vector<24x256xbf16>, vector<8x256xf32> -> vector<8x256xf32>
    %168 = arith.addf %160, %167 : vector<8x256xf32>
    %169 = vector.extract_strided_slice %148 {offsets = [0, 2], sizes = [8, 256], strides = [1, 1]} : vector<8x290xbf16> to vector<8x256xbf16>
    %170 = vector.extract_strided_slice %148 {offsets = [0, 18], sizes = [8, 256], strides = [1, 1]} : vector<8x290xbf16> to vector<8x256xbf16>
    %171 = vector.extract_strided_slice %148 {offsets = [0, 34], sizes = [8, 256], strides = [1, 1]} : vector<8x290xbf16> to vector<8x256xbf16>
    %172 = tpu.concatenate %169, %170, %171 in 0 : vector<8x256xbf16>, vector<8x256xbf16>, vector<8x256xbf16> -> vector<24x256xbf16>
    %c3_82 = arith.constant 3 : index
    %c0_83 = arith.constant 0 : index
    %173 = vector.load %arg4[%c3_82, %c0_83] : memref<5x256xbf16, #tpu.memory_space<vmem>>, vector<1x256xbf16>
    %174 = vector.broadcast %173 : vector<1x256xbf16> to vector<24x256xbf16>
    %175 = arith.mulf %172, %174 : vector<24x256xbf16>
    %c2_84 = arith.constant 2 : index
    %c0_85 = arith.constant 0 : index
    %c0_86 = arith.constant 0 : index
    %176 = vector.load %arg9[%c2_84, %c0_85, %c0_86] : memref<3x8x24xbf16, #tpu.memory_space<vmem>>, vector<1x8x24xbf16>
    %177 = vector.shape_cast %176 : vector<1x8x24xbf16> to vector<8x24xbf16>
    %cst_87 = arith.constant dense<0.000000e+00> : vector<8x256xf32>
    %178 = tpu.matmul %177, %175, %cst_87 {dimension_numbers = #tpu.dot_dimension_numbers<[1], [0], [0], [1], [0, 0, 1, 1], [], []>} : vector<8x24xbf16>, vector<24x256xbf16>, vector<8x256xf32> -> vector<8x256xf32>
    %179 = arith.addf %168, %178 : vector<8x256xf32>
    %c0_88 = arith.constant 0 : index
    %c0_89 = arith.constant 0 : index
    %180 = vector.load %arg10[%c0_88, %c0_89] : memref<8x1xf32, #tpu.memory_space<vmem>>, vector<8x1xf32>
    %181 = vector.broadcast %180 : vector<8x1xf32> to vector<8x256xf32>
    %182 = arith.addf %179, %181 : vector<8x256xf32>
    %183 = arith.addf %182, %104 : vector<8x256xf32>
    %cst_90 = arith.constant 0.000000e+00 : f32
    %184 = vector.broadcast %cst_90 : f32 to vector<8x256xf32>
    %185 = arith.maximumf %183, %184 : vector<8x256xf32>
    %c0_91 = arith.constant 0 : index
    %c0_92 = arith.constant 0 : index
    %c0_93 = arith.constant 0 : index
    %186 = vector.load %arg11[%c0_91, %c0_92, %c0_93] : memref<1x8x256xf32, #tpu.memory_space<vmem>>, vector<1x8x256xf32>
    %187 = vector.shape_cast %186 : vector<1x8x256xf32> to vector<8x256xf32>
    %188 = vector.shape_cast %185 : vector<8x256xf32> to vector<1x8x256xf32>
    tpu.vector_store %arg11[%c0_91, %c0_92, %c0_93], %188 {strides = array<i32>} : memref<1x8x256xf32, #tpu.memory_space<vmem>>, vector<1x8x256xf32>,
    return
  }
  func.func @transform_0(%arg0: i32) -> (i32, i32, i32, i32) {
    %c0_i32 = arith.constant 0 : i32
    %c0_i32_0 = arith.constant 0 : i32
    %c0_i32_1 = arith.constant 0 : i32
    %c0_i32_2 = arith.constant 0 : i32
    return %arg0, %c0_i32, %c0_i32_0, %c0_i32_1 : i32, i32, i32, i32
  }
  func.func @transform_1(%arg0: i32) -> (i32, i32, i32) {
    %c0_i32 = arith.constant 0 : i32
    %c0_i32_0 = arith.constant 0 : i32
    %c0_i32_1 = arith.constant 0 : i32
    return %arg0, %c0_i32, %c0_i32_0 : i32, i32, i32
  }
  func.func @transform_2(%arg0: i32) -> (i32, i32) {
    %c0_i32 = arith.constant 0 : i32
    %c0_i32_0 = arith.constant 0 : i32
    %c0_i32_1 = arith.constant 0 : i32
    return %c0_i32, %c0_i32_0 : i32, i32
  }
  func.func @transform_3(%arg0: i32) -> (i32, i32) {
    %c0_i32 = arith.constant 0 : i32
    %c0_i32_0 = arith.constant 0 : i32
    %c0_i32_1 = arith.constant 0 : i32
    return %c0_i32, %c0_i32_0 : i32, i32
  }
  func.func @transform_4(%arg0: i32) -> (i32, i32, i32) {
    %c0_i32 = arith.constant 0 : i32
    %c0_i32_0 = arith.constant 0 : i32
    %c0_i32_1 = arith.constant 0 : i32
    %c0_i32_2 = arith.constant 0 : i32
    return %c0_i32, %c0_i32_0, %c0_i32_1 : i32, i32, i32
  }
  func.func @transform_5(%arg0: i32) -> (i32, i32) {
    %c0_i32 = arith.constant 0 : i32
    %c0_i32_0 = arith.constant 0 : i32
    %c0_i32_1 = arith.constant 0 : i32
    return %c0_i32, %c0_i32_0 : i32, i32
  }
  func.func @transform_6(%arg0: i32) -> (i32, i32, i32) {
    %c0_i32 = arith.constant 0 : i32
    %c0_i32_0 = arith.constant 0 : i32
    %c0_i32_1 = arith.constant 0 : i32
    %c0_i32_2 = arith.constant 0 : i32
    return %c0_i32, %c0_i32_0, %c0_i32_1 : i32, i32, i32
  }
  func.func @transform_7(%arg0: i32) -> (i32, i32) {
    %c0_i32 = arith.constant 0 : i32
    %c0_i32_0 = arith.constant 0 : i32
    %c0_i32_1 = arith.constant 0 : i32
    return %c0_i32, %c0_i32_0 : i32, i32
  }
  func.func @transform_8(%arg0: i32) -> (i32, i32, i32) {
    %c0_i32 = arith.constant 0 : i32
    %c0_i32_0 = arith.constant 0 : i32
    %c0_i32_1 = arith.constant 0 : i32
    %c0_i32_2 = arith.constant 0 : i32
    return %c0_i32, %c0_i32_0, %c0_i32_1 : i32, i32, i32
  }
  func.func @transform_9(%arg0: i32) -> (i32, i32) {
    %c0_i32 = arith.constant 0 : i32
    %c0_i32_0 = arith.constant 0 : i32
    %c0_i32_1 = arith.constant 0 : i32
    return %c0_i32, %c0_i32_0 : i32, i32
  }
  func.func @transform_10(%arg0: i32) -> (i32, i32, i32) {
    %c0_i32 = arith.constant 0 : i32
    %c0_i32_0 = arith.constant 0 : i32
    %c0_i32_1 = arith.constant 0 : i32
    return %arg0, %c0_i32, %c0_i32_0 : i32, i32, i32
  }
}

</mosaic_0001>

<bundles_post_ra>
// kernel: tpu_custom_call.1
= control target key start
LH: loop header
LB: loop body
LE: loop exit
PB: predicated region body
PF: predicated region fallthrough
CT: control target
= control target key end

     0   :  { %s3451_s0 = inlined_call_operand.hbm [shape: bf16[2,8,8,8], index: 0, kind: input, shape index: {}]   ;;  %s3452_s1 = inlined_call_operand.vmem [shape: bf16[2,8,256], index: 1, kind: input, shape index: {}]   ;;  %s3453_s2 = inlined_call_operand.vmem [shape: bf16[8,16], index: 2, kind: input, shape index: {}]   ;;  %s3454_s3 = inlined_call_operand.hbm [shape: bf16[5,256], index: 3, kind: input, shape index: {}]   ;;  %s3455_s4 = inlined_call_operand.hbm [shape: bf16[5,16,40], index: 4, kind: input, shape index: {}]   ;;  %s3456_s5 = inlined_call_operand.vmem [shape: f32[16,1], index: 5, kind: input, shape index: {}]   ;;  %s3457_s6 = inlined_call_operand.vmem [shape: bf16[3,8,48], index: 6, kind: input, shape index: {}]   ;;  %s3458_s7 = inlined_call_operand.vmem [shape: f32[8,1], index: 7, kind: input, shape index: {}]   ;;  %s3459_s8 = inlined_call_operand.hbm [shape: bf16[3,8,24], index: 8, kind: input, shape index: {}]   ;;  %s3460_s9 = inlined_call_operand.vmem [shape: f32[8,1], index: 9, kind: input, shape index: {}]   ;;  %s3461_s10 = inlined_call_operand.hbm [shape: f32[2,8,256], index: 10, kind: output, shape index: {}]  }
   0x1   :  { %3464 = sst [smem:[#allocation17_spill]] %s3454_s3 }
   0x2   :  { %3465 = sst [smem:[#allocation18_spill]] %s3455_s4 }
   0x3   :  { %3466 = sst [smem:[#allocation19_spill]] %s3459_s8 }
   0x4   :  { %15 = vsyncpa [#allocation4], 0 }
   0x5   :  { %17 = vsyncpa [#allocation4 + $0x1], 0 }
   0x6   :  { %18 = vsyncpa [#allocation7], 0 }
   0x7   :  { %19 = vsyncpa [#allocation10], 0 }
   0x8   :  { %20 = vsyncpa [#allocation5], 0 }
   0x9   :  { %22 = vsyncpa [#allocation5 + $0x1], 0  ;;  %s2565_s13 = smov 0   ;;  %s2567_s14 = smov 0  }
   0xa   :  { %s2569_s15 = smov 0   ;;  %s2571_s16 = smov 0  }
   0xb LB: > { %s2586_s17 = sadd.s32 4294967295, %s2486_s16   ;;  %s2075_s18 = sadd.s32 4294967294, %s2486_s16   ;;  %s2486_s16 = sphi %s2571_s16, %s3484_s16   ;;  %s2482_s15 = sphi %s2569_s15, %s3483_s15   ;;  %s2478_s14 = sphi %s2567_s14, %s3482_s14   ;;  %s2474_s13 = sphi %s2565_s13, %s3481_s13  }
   0xc   : > { %p48_p0 = scmp.ne.s32.totalorder %s2478_s14, %s2474_s13  ;;  %p49_p1 = scmp.eq.s32.totalorder %s2586_s17, 0 }
   0xd   : > { %p266_p2 = scmp.eq.s32.totalorder %s2586_s17, 1  ;;  %p272_p3 = scmp.eq.s32.totalorder %s2075_s18, 1 }
   0xe   : > { %p2595_p4 = por %p49_p1, %p48_p0  ;;  %p2076_p5 = scmp.ge.s32.totalorder %s2486_s16, 1 }
   0xf   : > { %p2600_p6 = por %p272_p3, %p48_p0  ;;  %p279_p7 = scmp.lt.s32.totalorder %s2486_s16, 3 }
  0x10   : > { %s3469_s3 = sld [smem:[#allocation17_spill]]  ;;  %s2488_s25 = smov [#allocation6]  }
  0x11   : > { %p2608_p8 = pnand %p2076_p5, %p279_p7  ;;  %s296_s26 = sshll.u32 %s2488_s25, 4  ;;  %s297_s26 = int_to_ptr.vmem [resolvable:$true] %s296_s26 }
  0x12   : > { %s3471_s4 = sld [smem:[#allocation18_spill]]  ;;  %s2489_s11 = smov [#allocation8]  }
  0x13   : > { %p2189_p10 = pneg %p2608_p8  ;;  %s307_s12 = sshll.u32 %s2489_s11, 4  ;;  %s308_s12 = int_to_ptr.vmem [resolvable:$true] %s307_s12 }
  0x14   : > { %s3462_s18 = smov 64   ;;  %s3463_s21 = smov 4  }
  0x15   : > { %p2620_p11 = pnand %p2189_p10, %p49_p1  ;;  %s3473_s8 = sld [smem:[#allocation19_spill]] }
  0x16   : > { %s294_s23 = sshll.u32 %s3469_s3, 4  ;;  %s2640_s28 = sadd.s32 1, %s2486_s16   ;;  %s295_s23 = int_to_ptr.hbm [resolvable:$true] %s294_s23 }
  0x17   : > { %2192 = dma.hbm_to_vmem [thread:$0]  (!%p2620_p11), %s295_s23, 128, %s297_s26, [#allocation7]  }
  0x18   : > { %s305_s29 = sshll.u32 %s3471_s4, 4  ;;  %s2492_s23 = smov [#allocation9]   ;;  %s306_s29 = int_to_ptr.hbm [resolvable:$true] %s305_s29 }
  0x19   : > { %2195 = dma.hbm_to_vmem [thread:$0]  (!%p2620_p11), %s306_s29, 640, %s308_s12, [#allocation7], %s3462_s18, %s3462_s18, %s3463_s21  }
  0x1a   : > { %s330_s26 = sshll.u32 %s2492_s23, 4  ;;  %s32_s11 = ssub.s32 %s2486_s16, %s2640_s28  ;;  %s331_s26 = int_to_ptr.vmem [resolvable:$true] %s330_s26 }
  0x1b   : > { %s328_s27 = sshll.u32 %s3473_s8, 4  ;;  %s35_s29 = sadd.s32 1, %s2482_s15  ;;  %s329_s27 = int_to_ptr.hbm [resolvable:$true] %s328_s27 }
  0x1c   : > { %2198 = dma.hbm_to_vmem [thread:$0]  (!%p2620_p11), %s329_s27, 192, %s331_s26, [#allocation10], %s3462_s18, %s3462_s18, %s3463_s21  }
  0x1d   : > { %p33_p12 = scmp.eq.s32.totalorder %s32_s11, 0  ;;  %p42_p13 = scmp.ne.s32.totalorder %s2482_s15, %s2478_s14 }
  0x1e   : > { %p43_p0 = scmp.eq.s32.totalorder %s2486_s16, 0  ;;  %p2210_p5 = scmp.lt.s32.totalorder %s2486_s16, 2 }
  0x1f   : > { %s2649_s12 = scalar_select %p33_p12, %s2482_s15, %s35_s29  }
  0x20   : > { %p2653_p3 = por %p266_p2, %p42_p13  ;;  %s347_s30 = sand.u32 1, %s2482_s15  }
  0x21   : > { %3474 = sst [smem:[#allocation16_spill]] %s2649_s12  ;;  %s2161_s25 = sshll.u32 %s2486_s16, 5 }
  0x22   : > { %p44_p7 = por %p43_p0, %p42_p13  ;;  %s2081_s27 = sshll.u32 %s347_s30, 5 }
  0x23   : > { %s356_s18 = scalar_lea.hbm %s3451_s0, %s2161_s25  ;;  %s351_s11 = scalar_lea.vmem [#allocation3], %s2081_s27 }
  0x24   : > { %s357_s21 = sshll.u32 %s356_s18, 4  ;;  %s359_s3 = sshll.u32 %s351_s11, 4  ;;  %s358_s21 = int_to_ptr.hbm [resolvable:$true] %s357_s21  ;;  %s360_s3 = int_to_ptr.vmem [resolvable:$true] %s359_s3 }
  0x25   : > { %p2663_p10 = pnand %p2210_p5, %p44_p7  ;;  %s348_s4 = scalar_lea.sflag [#allocation4], %s347_s30 }
  0x26   : > { %s2382_s8 = sshra.s32 %s358_s21, 4  ;;  %s2389_s27 = scalar_lea.hbm %s3451_s0, 64  ;;  %s2383_s8 = int_to_ptr.hbm [resolvable:$true] %s2382_s8 }
  0x27   : > { %s2384_s12 = scalar_lea.hbm %s2383_s8, 32  ;;  %p2386_p11 = pneg %p2663_p10 }
  0x28   : > { %p2385_p2 = scmp.ne.s32.totalorder %s2383_s8, %s2384_s12  ;;  %p2390_p0 = scmp.lt.s32.totalorder %s2383_s8, %s3451_s0 }
  0x29   : > { %p2391_p5 = scmp.lt.s32.totalorder %s2389_s27, %s2384_s12 }
  0x2a   : > { %p2387_p12 = pnand %p2386_p11, %p2385_p2 }
  0x2b   : > { %p2392_p7 = por %p2391_p5, %p2390_p0 }
  0x2c   : > { %p2388_p13 = pneg %p2387_p12 }
  0x2e   : > { %p2393_p9 = pnand %p2392_p7, %p2388_p13 }
  0x30   : > { %2396 = shalt.err (!%p2393_p9)
}
  0x31   : > { %s3477_s30 = smov 4   ;;  %s3478_s11 = smov 64  }
  0x32   : > { %2202 = dma.hbm_to_vmem [thread:$0]  (!%p2663_p10), %s358_s21, 512, %s360_s3, %s348_s4, %s3478_s11, %s3478_s11, %s3477_s30  }
  0x33   : > { %379 = sbr.rel (%p2608_p8) target bundleno = 1912 (0x778), region = 60  ;;  %s2683_s25 = sand.u32 (!%p2608_p8), 1, %s2478_s14  }
  0x34   : > { %s2085_s8 = sshll.u32 (!%p2608_p8), %s2683_s25, 5  ;;  %s382_s12 = scalar_lea.sflag (!%p2608_p8), [#allocation4], %s2683_s25 }
  0x35   : > { %s385_s18 = scalar_lea.vmem (!%p2608_p8), [#allocation3], %s2085_s8 }
  0x38   : > { %2457 = dma.done.wait (%p2595_p4), %s382_s12, 512  }
  0x39   : > { %2459 = vsyncadd (%p2595_p4), %s382_s12, 4294966784 }
  0x3a   : > { %2461 = dma.done.wait (%p49_p1), [#allocation7], 768  }
  0x3b   : > { %2463 = vsyncadd (%p49_p1), [#allocation7], 4294966528 }
  0x3c   : > { %2465 = dma.done.wait (%p49_p1), [#allocation10], 192  }
  0x3d   : > { %2467 = vsyncadd (%p49_p1), [#allocation10], 4294967104  ;;  %vm494_vm0 = vcmask 1043456   ;;  %v460_v0 = vld [vmem:[%s3453_s2] sm:$0xf]  ;;  %v2163_v2 = vld [vmem:[%s385_s18] sm:$0xff] }
  0x3e   : > { %v496_v1 = vsel %vm494_vm0, %v460_v0, 0  ;;  %vm481_vm1 = vcmask 64512   ;;  %v2164_v3 = vld [vmem:[%s385_s18 + $0x8] sm:$0xff]  ;;  %v2165_v4 = vld [vmem:[%s385_s18 + $0x10] sm:$0xff]  ;;  %v2166_v5 = vld [vmem:[%s385_s18 + $0x18] sm:$0xff]  ;;  %vm552_vm2 = vcmask 1041409  }
  0x3f   : > { %505 = vmatpush.bf16.msra.mxu0 %v496_v1  ;;  %vm555_vm3 = vcmask 1042434   ;;  %vm558_vm4 = vcmask 1043459   ;;  %vm561_vm5 = vcmask 1044484   ;;  %vm564_vm6 = vcmask 1045509   ;;  %s2493_s19 = smov 66   ;;  %s2494_s24 = smov 34  }
  0x40   : > { %vm567_vm7 = vcmask 1046534   ;;  %vm570_vm8 = vcmask 1047559   ;;  %s2495_s21 = smov 2   ;;  %s2496_s29 = smov 98   ;;  %vm450_vm9 = vcmask 551936   ;;  %vm636_vm10 = vcmask 142352  }
  0x41   : > { %s2498_s27 = smov 3   ;;  %s2499_s23 = smov 1   ;;  %vm576_vm11 = vcmask 404752   ;;  %vm596_vm12 = vcmask 667152   ;;  %vm616_vm13 = vcmask 929552   ;;  %vm757_vm14 = vcmask 523264  }
  0x42   : > { %2108 = vmatmul.msk.bf16.vlgmr.msra.gmra.mxu0 %vm481_vm1, %v2163_v2  ;;  %s2500_s26 = smov 96   ;;  %s2501_s30 = smov 64   ;;  %vm739_vm15 = vcmask 785408  }
  0x43   : > { %s2502_s11 = smov 80   ;;  %s2503_s8 = smov 4  }
  0x44   : > { %s2504_s12 = smov 112   ;;  %s2505_s18 = smov 126  }
  0x45   : > { %s2506_s3 = smov 127   ;;  %s2507_s4 = smov 125  }
  0x46   : > { %p443_p1 = scmp.lt.s32.totalorder %s2586_s17, 1 }
  0x52   : > { %2109 = vmatmul.msk.bf16.gmra.mxu0 %vm481_vm1, %v2164_v3 }
  0x62   : > { %2110 = vmatmul.msk.bf16.gmra.mxu0 %vm481_vm1, %v2165_v4 }
  0x72   : > { %2111 = vmatmul.msk.bf16.gmra.mxu0 %vm481_vm1, %v2166_v5  ;;  %vm748_vm1 = vcmask 654336  }
  0xbf   : > { %v507_v6 = vpop.f32.mrf.mxu0 }
  0xc0   : > { %v527_v11 = vpack.c.bf16 %v507_v6, %v507_v6 }
  0xc2   : > { %v2703_v13 = vunpack.c.l.b16 %v527_v11 }
  0xc4   : > { %v657_v17 = vrot.slane %v2703_v13, 5  ;;  %v638_v20 = vrot.slane %v2703_v13, 4  ;;  %v618_v21 = vrot.slane %v2703_v13, 3  ;;  %v598_v23 = vrot.slane %v2703_v13, 2 }
  0xc5   : > { %v578_v24 = vrot.slane %v2703_v13, 1  ;;  %v695_v25 = vrot.slane %v2703_v13, 7  ;;  %v676_v29 = vrot.slane %v2703_v13, 6 }
  0xc7   : > { %v509_v7 = vpop.f32.mrf.mxu0 }
  0xc8   : > { %v528_v12 = vpack.c.bf16 %v509_v7, %v509_v7 }
  0xca   : > { %v2705_v14 = vunpack.c.l.b16 %v528_v12 }
  0xcc   : > { %v658_v19 = vrot.slane %v2705_v14, 4  ;;  %v639_v26 = vrot.slane %v2705_v14, 3  ;;  %v619_v27 = vrot.slane %v2705_v14, 2  ;;  %v599_v28 = vrot.slane %v2705_v14, 1 }
  0xcd   : > { %v579_v31 = vsel %vm552_vm2, %v2705_v14, %v578_v24  ;;  %v551_v32 = vrot.slane %v2705_v14, 7  ;;  %v696_v33 = vrot.slane %v2705_v14, 6  ;;  %v677_v38 = vrot.slane %v2705_v14, 5 }
  0xce   : > { %v659_v37 = vsel %vm552_vm2, %v658_v19, %v657_v17  ;;  %v640_v44 = vsel %vm552_vm2, %v639_v26, %v638_v20  ;;  %v600_v45 = vsel %vm552_vm2, %v599_v28, %v598_v23  ;;  %v620_v48 = vsel %vm552_vm2, %v619_v27, %v618_v21 }
  0xcf   : > { %v512_v8 = vpop.f32.mrf.mxu0  ;;  %v553_v50 = vsel %vm552_vm2, %v551_v32, %v2703_v13 }
  0xd0   : > { %v529_v16 = vpack.c.bf16 %v512_v8, %v512_v8 }
  0xd2   : > { %v2711_v22 = vunpack.c.l.b16 %v529_v16 }
  0xd4   : > { %v660_v39 = vrot.slane %v2711_v22, 3  ;;  %v641_v40 = vrot.slane %v2711_v22, 2  ;;  %v621_v41 = vrot.slane %v2711_v22, 1  ;;  %v580_v42 = vrot.slane %v2711_v22, 7 }
  0xd5   : > { %v554_v46 = vrot.slane %v2711_v22, 6  ;;  %v601_v49 = vsel %vm555_vm3, %v2711_v22, %v600_v45 }
  0xd6   : > { %v661_v55 = vsel %vm555_vm3, %v660_v39, %v659_v37  ;;  %v642_v56 = vsel %vm555_vm3, %v641_v40, %v640_v44  ;;  %v622_v57 = vsel %vm555_vm3, %v621_v41, %v620_v48  ;;  %v581_v58 = vsel %vm555_vm3, %v580_v42, %v579_v31 }
  0xd7   : > { %v514_v9 = vpop.f32.mrf.mxu0  ;;  %v556_v61 = vsel %vm555_vm3, %v554_v46, %v553_v50 }
  0xd8   : > { %v530_v18 = vpack.c.bf16 %v514_v9, %v514_v9 }
  0xda   : > { %v2724_v34 = vunpack.c.l.b16 %v530_v18 }
  0xdc   : > { %v662_v52 = vrot.slane %v2724_v34, 2  ;;  %v643_v53 = vrot.slane %v2724_v34, 1  ;;  %v602_v54 = vrot.slane %v2724_v34, 7  ;;  %v623_v60 = vsel %vm558_vm4, %v2724_v34, %v622_v57 }
  0xdd   : > { %v582_v0 = vrot.slane %v2724_v34, 6  ;;  %v557_v1 = vrot.slane %v2724_v34, 5 }
  0xde   : > { %v663_v3 = vsel %vm558_vm4, %v662_v52, %v661_v55  ;;  %v644_v4 = vsel %vm558_vm4, %v643_v53, %v642_v56  ;;  %v603_v6 = vsel %vm558_vm4, %v602_v54, %v601_v49 }
  0xdf   : > { %v517_v10 = vpop.f32.mrf.mxu0  ;;  %v583_v49 = vsel %vm558_vm4, %v582_v0, %v581_v58  ;;  %v559_v55 = vsel %vm558_vm4, %v557_v1, %v556_v61  ;;  %v679_v61 = vrot.slane %v2711_v22, 4 }
  0xe0   : > { %v531_v30 = vpack.c.bf16 %v517_v10, %v517_v10 }
  0xe2   : > { %v2735_v47 = vunpack.c.l.b16 %v531_v30 }
  0xe4   : > { %v664_v62 = vrot.slane %v2735_v47, 1  ;;  %v624_v63 = vrot.slane %v2735_v47, 7  ;;  %v645_v8 = vsel %vm561_vm5, %v2735_v47, %v644_v4  ;;  %v604_v10 = vrot.slane %v2735_v47, 6 }
  0xe5   : > { %v584_v16 = vrot.slane %v2735_v47, 5  ;;  %v560_v20 = vrot.slane %v2735_v47, 4 }
  0xe6   : > { %v665_v18 = vsel %vm561_vm5, %v664_v62, %v663_v3  ;;  %v625_v19 = vsel %vm561_vm5, %v624_v63, %v623_v60  ;;  %v605_v53 = vsel %vm561_vm5, %v604_v10, %v603_v6  ;;  %v698_v62 = vrot.slane %v2711_v22, 5 }
  0xe7   : > { %v519_v15 = vpop.f32.mrf.mxu0  ;;  %v585_v54 = vsel %vm561_vm5, %v584_v16, %v583_v49  ;;  %v562_v60 = vsel %vm561_vm5, %v560_v20, %v559_v55  ;;  %v681_v22 = vrot.slane %v2724_v34, 3 }
  0xe8   : > { %v532_v35 = vpack.c.bf16 %v519_v15, %v519_v15 }
  0xea   : > { %v2742_v51 = vunpack.c.l.b16 %v532_v35 }
  0xec   : > { %v646_v5 = vrot.slane %v2742_v51, 7  ;;  %v626_v9 = vrot.slane %v2742_v51, 6  ;;  %v666_v21 = vsel %vm564_vm6, %v2742_v51, %v665_v18  ;;  %v606_v24 = vrot.slane %v2742_v51, 5 }
  0xed   : > { %v586_v26 = vrot.slane %v2742_v51, 4  ;;  %v563_v37 = vrot.slane %v2742_v51, 3  ;;  %v704_v10 = vrot.slane %v2742_v51, 2 }
  0xee   : > { %v647_v23 = vsel %vm564_vm6, %v646_v5, %v645_v8  ;;  %v627_v30 = vsel %vm564_vm6, %v626_v9, %v625_v19  ;;  %v607_v57 = vsel %vm564_vm6, %v606_v24, %v605_v53  ;;  %v700_v5 = vrot.slane %v2724_v34, 4 }
  0xef   : > { %v522_v36 = vpop.f32.mrf.mxu0  ;;  %v587_v58 = vsel %vm564_vm6, %v586_v26, %v585_v54  ;;  %v702_v8 = vrot.slane %v2735_v47, 3 }
  0xf0   : > { %v533_v43 = vpack.c.bf16 %v522_v36, %v522_v36 }
  0xf2   : > { %v2751_v59 = vunpack.c.l.b16 %v533_v43 }
  0xf4   : > { %v667_v11 = vrot.slane %v2751_v59, 7  ;;  %v648_v12 = vrot.slane %v2751_v59, 6  ;;  %v628_v15 = vrot.slane %v2751_v59, 5  ;;  %v608_v42 = vrot.slane %v2751_v59, 4 }
  0xf5   : > { %v588_v46 = vrot.slane %v2751_v59, 3  ;;  %v566_v52 = vrot.slane %v2751_v59, 2 }
  0xf6   : > { %v668_v32 = vsel %vm567_vm7, %v667_v11, %v666_v21  ;;  %v649_v35 = vsel %vm567_vm7, %v648_v12, %v647_v23  ;;  %v629_v36 = vsel %vm567_vm7, %v628_v15, %v627_v30  ;;  %v609_v63 = vsel %vm567_vm7, %v608_v42, %v607_v57  ;;  %v1091_v30 = vld [vmem:[#allocation6] sm:$0x22] }
  0xf7   : > { %v524_v2 = vpop.f32.mrf.mxu0  ;;  %v589_v0 = vsel %vm567_vm7, %v588_v46, %v587_v58  ;;  %v678_v11 = vsel %vm552_vm2, %v677_v38, %v676_v29  ;;  %v683_v12 = vrot.slane %v2735_v47, 2 }
  0xf8   : > { %v534_v7 = vpack.c.bf16 %v524_v2, %v524_v2  ;;  %v565_v2 = vsel %vm564_vm6, %v563_v37, %v562_v60  ;;  %v680_v19 = vsel %vm555_vm3, %v679_v61, %v678_v11 }
  0xf9   : > { %v568_v4 = vsel %vm567_vm7, %v566_v52, %v565_v2  ;;  %v682_v14 = vsel %vm558_vm4, %v681_v22, %v680_v19 }
  0xfa   : > { %v2772_v17 = vunpack.c.l.b16 %v534_v7  ;;  %v697_v7 = vsel %vm552_vm2, %v696_v33, %v695_v25  ;;  %v706_v25 = vrot.slane %v2751_v59, 1  ;;  %v685_v33 = vrot.slane %v2742_v51, 1 }
  0xfb   : > { %v699_v9 = vsel %vm555_vm3, %v698_v62, %v697_v7  ;;  %v684_v47 = vsel %vm561_vm5, %v683_v12, %v682_v14  ;;  %vm852_vm2 = vcmask 7168   ;;  %vm730_vm3 = vcmask 916480  }
  0xfc   : > { %v669_v27 = vrot.slane %v2772_v17, 6  ;;  %v650_v28 = vrot.slane %v2772_v17, 5  ;;  %v630_v31 = vrot.slane %v2772_v17, 4  ;;  %v610_v48 = vrot.slane %v2772_v17, 3 }
  0xfd   : > { %v590_v50 = vrot.slane %v2772_v17, 2  ;;  %v569_v56 = vrot.slane %v2772_v17, 1  ;;  %v701_v34 = vsel %vm558_vm4, %v700_v5, %v699_v9  ;;  %v688_v29 = vrot.slane %v2772_v17, 7 }
  0xfe   : > { %v670_v39 = vsel %vm570_vm8, %v669_v27, %v668_v32  ;;  %v651_v40 = vsel %vm570_vm8, %v650_v28, %v649_v35  ;;  %v631_v41 = vsel %vm570_vm8, %v630_v31, %v629_v36  ;;  %v611_v1 = vsel %vm570_vm8, %v610_v48, %v609_v63 }
  0xff   : > { %v671_v43 = vpack.c.b16 %v670_v39, %v670_v39  ;;  %v652_v44 = vpack.c.b16 %v651_v40, %v651_v40  ;;  %v632_v45 = vpack.c.b16 %v631_v41, %v631_v41  ;;  %v591_v3 = vsel %vm570_vm8, %v590_v50, %v589_v0  ;;  %v778_v40 = vld [vmem:[#allocation6] sm:$0x11] }
 0x100   : > { %v571_v6 = vsel %vm570_vm8, %v569_v56, %v568_v4  ;;  %v612_v15 = vpack.c.b16 %v611_v1, %v611_v1  ;;  %v592_v16 = vpack.c.b16 %v591_v3, %v591_v3  ;;  %v703_v13 = vsel %vm561_vm5, %v702_v8, %v701_v34  ;;  %v1231_v3 = vld [vmem:[#allocation6] sm:$0x44] }
 0x101   : > { %672 = vrot.lane.b32.xlu2 %v671_v43, %s2493_s19  ;;  %653 = vrot.lane.b32.xlu1 %v652_v44, %s2494_s24  ;;  %v572_v18 = vpack.c.b16 %v571_v6, %v571_v6  ;;  %v705_v38 = vsel %vm564_vm6, %v704_v10, %v703_v13  ;;  %v686_v20 = vsel %vm564_vm6, %v685_v33, %v684_v47  ;;  %v2497_v28 = vmov 0  }
 0x102   : > { %633 = vrot.lane.b32.xlu0 %v632_v45, %s2495_s21  ;;  %v707_v51 = vsel %vm567_vm7, %v706_v25, %v705_v38  ;;  %v687_v23 = vsel %vm567_vm7, %v2751_v59, %v686_v20  ;;  %449 = vst [vmem:[#allocation2] sm:$0xff] %v2497_v28  ;;  %2284 = vset.pattern.permute.xlu2 %v2497_v28  ;;  %v1093_v31 = vunpack.c.l.b16 %v1091_v30  ;;  %v1094_v32 = vunpack.c.h.b16 %v1091_v30 }
 0x103   : > { %v708_v21 = vsel %vm570_vm8, %v2772_v17, %v707_v51  ;;  %v689_v24 = vsel %vm570_vm8, %v688_v29, %v687_v23  ;;  %2290 = vset.pattern.permute.xlu0 %v2497_v28  ;;  %2291 = vset.pattern.permute.xlu1 %v2497_v28  ;;  %v780_v41 = vunpack.c.l.b16 %v778_v40  ;;  %v781_v42 = vunpack.c.h.b16 %v778_v40  ;;  %451 = vst.msk [vmem:[#allocation2 + $0x8] sm:$0xf] %vm450_vm9, %v2497_v28 }
 0x104   : > { %v709_v26 = vpack.c.b16 %v708_v21, %v708_v21  ;;  %v690_v27 = vpack.c.b16 %v689_v24, %v689_v24  ;;  %v1095_v35 = vpack.c.b16 %v1093_v31, %v1093_v31  ;;  %v1096_v17 = vpack.c.b16 %v1094_v32, %v1094_v32 }
 0x105   : > { %v2853_v45 = vpack.c.b16 %v780_v41, %v780_v41  ;;  %v2855_v46 = vpack.c.b16 %v781_v42, %v781_v42  ;;  %v1233_v5 = vunpack.c.l.b16 %v1231_v3  ;;  %v1234_v6 = vunpack.c.h.b16 %v1231_v3 }
 0x106   : > { %v1098_v36 = vshrl.u32 %v1095_v35, 16  ;;  %v1103_v37 = vshrl.u32 %v1096_v17, 16  ;;  %vm1115_vm4 = vcmask 23552   ;;  %vm1253_vm5 = vcmask 31744  }
 0x107   : > { %v831_v50 = vshrl.u32 %v2853_v45, 16  ;;  %v835_v52 = vshrl.u32 %v2855_v46, 16  ;;  %v1235_v22 = vpack.c.b16 %v1233_v5, %v1233_v5  ;;  %v1236_v9 = vpack.c.b16 %v1234_v6, %v1234_v6 }
 0x108   : > { %v1099_v59 = vpack.i.b16 %v1098_v36, %v1098_v36  ;;  %v1104_v39 = vpack.i.b16 %v1103_v37, %v1103_v37  ;;  %vm1039_vm6 = vcmask 1031168   ;;  %vm927_vm7 = vcmask 326656  }
 0x109   : > { %613 = vrot.lane.b32.xlu2 %v612_v15, %s2496_s29  ;;  %593 = vrot.lane.b32.xlu1 %v592_v16, %s2493_s19  ;;  %v832_v54 = vpack.i.b16 %v831_v50, %v831_v50  ;;  %v836_v55 = vpack.i.b16 %v835_v52, %v835_v52  ;;  %v1238_v10 = vpack.i.b16 %v1235_v22, %v1235_v22  ;;  %s2508_s19 = smov 124   ;;  %vm916_vm8 = vcmask 1039360  }
 0x10a   : > { %573 = vrot.lane.b32.xlu0 %v572_v18, %s2494_s24  ;;  %v1101_v43 = vperm.slane %v1099_v59, 1  ;;  %v1106_v44 = vperm.slane %v1104_v39, 1  ;;  %v1242_v11 = vpack.i.b16 %v1236_v9, %v1236_v9  ;;  %vm1179_vm9 = vcmask 1022976  }
 0x10b   : > { %v834_v56 = vperm.slane %v832_v54, 0  ;;  %v838_v57 = vperm.slane %v836_v55, 0  ;;  %v1240_v25 = vperm.slane %v1238_v10, 2 }
 0x10c   : > { %v1107_v48 = vunpack.c.l.bf16 %v1101_v43  ;;  %v1108_v49 = vunpack.c.l.bf16 %v1106_v44  ;;  %v1244_v33 = vperm.slane %v1242_v11, 2 }
 0x10d   : > { %v2862_v58 = vunpack.c.l.bf16 %v834_v56  ;;  %v2864_v60 = vunpack.c.l.bf16 %v838_v57  ;;  %v1245_v13 = vunpack.c.l.bf16 %v1240_v25 }
 0x10e   : > { %v2859_v53 = vpack.i.bf16 %v1108_v49, %v1107_v48  ;;  %v1246_v14 = vunpack.c.l.bf16 %v1244_v33 }
 0x10f   : > { %v2269_v62 = vpack.i.bf16 %v2864_v60, %v2862_v58 }
 0x110   : > { %v2279_v38 = vpack.i.bf16 %v1246_v14, %v1245_v13 }
 0x111   : > { %710 = vrot.lane.b32.xlu1 %v709_v26, %s2495_s21  ;;  %2270 = vrot.lane.b32.xlu2 %v2269_v62, %s2499_s23  ;;  %v785_v26 = vpack.i.b16 %v2853_v45, %v2853_v45 }
 0x112   : > { %691 = vrot.lane.b32.xlu0 %v690_v27, %s2496_s29 }
 0x113   : > { %v787_v27 = vperm.slane %v785_v26, 0 }
 0x115   : > { %v2901_v17 = vunpack.c.l.bf16 %v787_v27 }
 0x11a   : > { %2275 = vrot.lane.b32.xlu0 %v2859_v53, %s2498_s27  ;;  %s444_s27 = scalar_select %p443_p1, %s2586_s17, 1 }
 0x11c   : > { %s2162_s23 = sshll.u32 %s444_s27, 3 }
 0x15b   : > { %v673_v0 = vpop.permute.xlu2 %672 }
 0x163   : > { %v614_v4 = vpop.permute.xlu2 %613 }
 0x16b   : > { %v2271_v51 = vpop.permute.xlu2 %2270 }
 0x16c   : > { %v2894_v30 = vunpack.i.h.bf16 %v2271_v51 }
 0x173   : > { %v654_v63 = vpop.permute.xlu1 %653 }
 0x174   : > { %v634_v2 = vpop.permute.xlu0 %633 }
 0x175   : > { %637 = vst.msk [vmem:[#allocation2 + $0x4] sm:$0xf] %vm636_vm10, %v634_v2 }
 0x176   : > { %656 = vst.msk [vmem:[#allocation2 + $0x4] sm:$0xf] %vm576_vm11, %v654_v63 }
 0x177   : > { %675 = vst.msk [vmem:[#allocation2 + $0x4] sm:$0xf] %vm596_vm12, %v673_v0 }
 0x17b   : > { %v594_v61 = vpop.permute.xlu1 %593 }
 0x17c   : > { %v574_v1 = vpop.permute.xlu0 %573 }
 0x17d   : > { %577 = vst.msk [vmem:[#allocation2] sm:$0xf] %vm576_vm11, %v574_v1  ;;  %vm1411_vm11 = vcmask 138240  }
 0x17e   : > { %597 = vst.msk [vmem:[#allocation2] sm:$0xf] %vm596_vm12, %v594_v61  ;;  %vm1578_vm12 = vcmask 15360  }
 0x17f   : > { %617 = vst.msk [vmem:[#allocation2] sm:$0xf] %vm616_vm13, %v614_v4 }
 0x183   : > { %v711_v7 = vpop.permute.xlu1 %710 }
 0x184   : > { %713 = vst.msk [vmem:[#allocation2 + $0x8] sm:$0xf] %vm636_vm10, %v711_v7  ;;  %v692_v8 = vpop.permute.xlu0 %691  ;;  %vm1317_vm10 = vcmask 1014784  }
 0x185   : > { %694 = vst.msk [vmem:[#allocation2 + $0x4] sm:$0xf] %vm616_vm13, %v692_v8  ;;  %vm1507_vm13 = vcmask 392192  }
 0x18b   : > { %v715_v12 = vld [vmem:[#allocation2 + $0x8] sm:$0xf] }
 0x18c   : > { %v722_v15 = vunpack.c.l.b16 %v715_v12  ;;  %v714_v16 = vld [vmem:[#allocation2] sm:$0xff]  ;;  %v2890_v24 = vpop.permute.xlu0 %2275  ;;  %v2968_v12 = vunpack.i.l.bf16 %v2271_v51 }
 0x18d   : > { %v718_v18 = vunpack.c.h.b16 %v714_v16  ;;  %v717_v29 = vunpack.c.l.b16 %v714_v16  ;;  %v2989_v51 = vunpack.i.l.bf16 %v2890_v24  ;;  %v2996_v26 = vunpack.i.h.bf16 %v2890_v24 }
 0x18e   : > { %v723_v34 = vpack.c.b16 %v722_v15, %v722_v15 }
 0x18f   : > { %v2870_v19 = vpack.c.b16 %v718_v18, %v718_v18  ;;  %v2874_v47 = vpack.c.b16 %v717_v29, %v717_v29  ;;  %v789_v18 = vpack.i.b16 %v2855_v46, %v2855_v46  ;;  %v3010_v24 = vsel %vm1115_vm4, %v2989_v51, %v2996_v26 }
 0x190   : > { %737 = vrot.lane.b32.xlu2 %v723_v34, %s2500_s26  ;;  %755 = vrot.lane.b32.xlu1 %v723_v34, %s2501_s30 }
 0x191   : > { %753 = vrot.lane.b32.xlu0 %v2870_v19, %s2501_s30 }
 0x198   : > { %746 = vrot.lane.b32.xlu2 %v723_v34, %s2502_s11  ;;  %2280 = vrot.lane.b32.xlu1 %v2279_v38, %s2503_s8  ;;  %s447_s8 = scalar_lea.vmem %s3452_s1, %s2162_s23 }
 0x199   : > { %733 = vrot.lane.b32.xlu0 %v2874_v47, %s2500_s26 }
 0x1a0   : > { %735 = vrot.lane.b32.xlu1 %v2870_v19, %s2500_s26  ;;  %751 = vrot.lane.b32.xlu2 %v2874_v47, %s2501_s30 }
 0x1a1   : > { %742 = vrot.lane.b32.xlu0 %v2874_v47, %s2502_s11 }
 0x1a8   : > { %744 = vrot.lane.b32.xlu1 %v2870_v19, %s2502_s11  ;;  %728 = vrot.lane.b32.xlu2 %v723_v34, %s2504_s12 }
 0x1a9   : > { %724 = vrot.lane.b32.xlu0 %v2874_v47, %s2504_s12 }
 0x1b0   : > { %726 = vrot.lane.b32.xlu1 %v2870_v19, %s2504_s12 }
 0x1ea   : > { %v2888_v20 = vpop.permute.xlu2 %737 }
 0x1f2   : > { %v747_v21 = vpop.permute.xlu2 %746 }
 0x1f3   : > { %v829_v42 = vsel %vm494_vm0, %v2888_v20, %v747_v21 }
 0x1f4   : > { %v2929_v50 = vunpack.c.l.bf16 %v829_v42  ;;  %v2931_v52 = vunpack.c.h.bf16 %v829_v42 }
 0x1f6   : > { %v865_v6 = vmul.f32 %v2894_v30, %v2929_v50  ;;  %v868_v7 = vmul.f32 %v2894_v30, %v2931_v52 }
 0x1f8   : > { %v877_v8 = vpack.c.bf16 %v868_v7, %v865_v6 }
 0x1fa   : > { %v752_v23 = vpop.permute.xlu2 %751 }
 0x202   : > { %v756_v28 = vpop.permute.xlu1 %755  ;;  %v2898_v35 = vpop.permute.xlu2 %728 }
 0x203   : > { %v2896_v31 = vunpack.c.l.bf16 %v756_v28  ;;  %v754_v32 = vpop.permute.xlu0 %753  ;;  %1037 = vrot.lane.b32.xlu1 %v756_v28, %s2505_s18  ;;  %v2911_v39 = vsel %vm494_vm0, %v723_v34, %v2898_v35 }
 0x204   : > { %v758_v36 = vsel %vm757_vm14, %v752_v23, %v754_v32  ;;  %v2918_v43 = vunpack.c.l.bf16 %v2911_v39  ;;  %v2921_v44 = vunpack.c.h.bf16 %v2911_v39  ;;  %v759_v1 = vsel %vm757_vm14, %v754_v32, %v756_v28 }
 0x205   : > { %1033 = vrot.lane.b32.xlu2 %v758_v36, %s2505_s18  ;;  %v2905_v37 = vunpack.c.l.bf16 %v758_v36  ;;  %v871_v59 = vmul.f32 %v2894_v30, %v2896_v31  ;;  %v2978_v34 = vunpack.c.l.bf16 %v759_v1  ;;  %v853_v23 = vsel %vm852_vm2, %v2968_v12, %v2894_v30 }
 0x206   : > { %v859_v55 = vmul.f32 %v2894_v30, %v2918_v43  ;;  %v862_v56 = vmul.f32 %v2894_v30, %v2921_v44  ;;  %vm1779_vm14 = vcmask 195584  }
 0x207   : > { %v880_v40 = vpack.c.bf16 %v871_v59, %v871_v59  ;;  %v812_v41 = vmul.f32 %v2901_v17, %v2905_v37  ;;  %v869_v13 = vmul.f32 %v2968_v12, %v2905_v37  ;;  %v870_v36 = vmul.f32 %v853_v23, %v2978_v34 }
 0x208   : > { %v874_v4 = vpack.c.bf16 %v862_v56, %v859_v55 }
 0x209   : > { %914 = vrot.lane.b32.xlu0 %v880_v40, %s2506_s3  ;;  %v818_v45 = vpack.c.bf16 %v812_v41, %v812_v41  ;;  %v878_v32 = vpack.c.bf16 %v869_v13, %v869_v13  ;;  %v879_v56 = vpack.c.bf16 %v870_v36, %v870_v36 }
 0x20a   : > { %v2924_v48 = vpop.permute.xlu1 %2280 }
 0x20b   : > { %v2927_v49 = vunpack.i.h.bf16 %v2924_v48  ;;  %1031 = vrot.lane.b32.xlu1 %v829_v42, %s2505_s18  ;;  %v974_v54 = vsel %vm494_vm0, %v818_v45, 0  ;;  %v734_v63 = vpop.permute.xlu0 %733 }
 0x20c   : > { %984 = vmatpush.bf16.msra.mxu3 %v974_v54 }
 0x20d   : > { %v2941_v57 = vmul.f32 %v2927_v49, %v2929_v50  ;;  %v2945_v62 = vmul.f32 %v2927_v49, %v2931_v52  ;;  %v2949_v0 = vmul.f32 %v2927_v49, %v2918_v43  ;;  %v2953_v2 = vmul.f32 %v2927_v49, %v2921_v44 }
 0x20f   : > { %v1278_v61 = vpack.c.bf16 %v2945_v62, %v2941_v57  ;;  %v1275_v3 = vpack.c.bf16 %v2953_v2, %v2949_v0 }
 0x211   : > { %1035 = vrot.lane.b32.xlu0 %v759_v1, %s2505_s18 }
 0x212   : > { %v736_v5 = vpop.permute.xlu1 %735 }
 0x213   : > { %902 = vrot.lane.b32.xlu1 %v874_v4, %s2506_s3  ;;  %v743_v22 = vpop.permute.xlu0 %742  ;;  %v740_v10 = vsel %vm739_vm15, %v734_v63, %v736_v5  ;;  %v741_v14 = vsel %vm739_vm15, %v736_v5, %v2888_v20  ;;  %v791_v20 = vperm.slane %v789_v18, 0 }
 0x219   : > { %908 = vrot.lane.b32.xlu0 %v877_v8, %s2506_s3 }
 0x21a   : > { %v745_v9 = vpop.permute.xlu1 %744 }
 0x21b   : > { %v749_v11 = vsel %vm748_vm1, %v743_v22, %v745_v9  ;;  %v750_v16 = vsel %vm748_vm1, %v745_v9, %v747_v21  ;;  %v725_v27 = vpop.permute.xlu0 %724  ;;  %v1133_v9 = vmul.f32 %v3010_v24, %v2978_v34 }
 0x21c   : > { %v772_v15 = vsel %vm494_vm0, %v740_v10, %v749_v11  ;;  %v776_v46 = vsel %vm494_vm0, %v741_v14, %v750_v16 }
 0x21d   : > { %v2971_v25 = vunpack.c.l.bf16 %v772_v15  ;;  %v2973_v33 = vunpack.c.h.bf16 %v772_v15  ;;  %1027 = vrot.lane.b32.xlu2 %v772_v15, %s2505_s18  ;;  %v2999_v59 = vunpack.c.l.bf16 %v776_v46  ;;  %v3001_v40 = vunpack.c.h.bf16 %v776_v46 }
 0x21e   : > { %v1142_v18 = vpack.c.bf16 %v1133_v9, %v1133_v9 }
 0x21f   : > { %v808_v29 = vmul.f32 %v2901_v17, %v2971_v25  ;;  %v810_v38 = vmul.f32 %v2901_v17, %v2973_v33  ;;  %v863_v63 = vmul.f32 %v2968_v12, %v2971_v25  ;;  %v864_v14 = vmul.f32 %v853_v23, %v2999_v59 }
 0x221   : > { %1029 = vrot.lane.b32.xlu0 %v776_v46, %s2505_s18  ;;  %v816_v21 = vpack.c.bf16 %v810_v38, %v808_v29  ;;  %v867_v29 = vmul.f32 %v853_v23, %v3001_v40 }
 0x222   : > { %v727_v28 = vpop.permute.xlu1 %726 }
 0x223   : > { %v731_v41 = vsel %vm730_vm3, %v725_v27, %v727_v28  ;;  %v732_v42 = vsel %vm730_vm3, %v727_v28, %v2898_v35  ;;  %985 = vmatpush.bf16.msra.mxu3 %v816_v21  ;;  %v3020_v35 = vunpack.c.l.bf16 %v791_v20  ;;  %v2282_v21 = vunpack.i.l.bf16 %v2924_v48 }
 0x224   : > { %v764_v30 = vsel %vm494_vm0, %v2874_v47, %v731_v41  ;;  %v768_v45 = vsel %vm494_vm0, %v2870_v19, %v732_v42  ;;  %v1132_v47 = vmul.f32 %v2989_v51, %v2905_v37  ;;  %v866_v19 = vmul.f32 %v2968_v12, %v2973_v33 }
 0x225   : > { %910 = vrot.lane.b32.xlu2 %v878_v32, %s2506_s3  ;;  %v3015_v54 = vunpack.c.l.bf16 %v764_v30  ;;  %v3017_v55 = vunpack.c.h.bf16 %v764_v30  ;;  %1021 = vrot.lane.b32.xlu1 %v764_v30, %s2505_s18  ;;  %v3034_v5 = vmul.f32 %v3020_v35, %v2999_v59  ;;  %v3038_v6 = vmul.f32 %v3020_v35, %v3001_v40 }
 0x226   : > { %v3040_v7 = vunpack.c.l.bf16 %v768_v45  ;;  %v3042_v8 = vunpack.c.h.bf16 %v768_v45  ;;  %v875_v10 = vpack.c.bf16 %v866_v19, %v863_v63  ;;  %v876_v20 = vpack.c.bf16 %v867_v29, %v864_v14 }
 0x227   : > { %v804_v1 = vmul.f32 %v2901_v17, %v3015_v54  ;;  %v806_v4 = vmul.f32 %v2901_v17, %v3017_v55  ;;  %v1141_v17 = vpack.c.bf16 %v1132_v47, %v1132_v47  ;;  %v817_v11 = vpack.c.bf16 %v3038_v6, %v3034_v5 }
 0x228   : > { %v3051_v15 = vmul.f32 %v3020_v35, %v3040_v7  ;;  %v3055_v16 = vmul.f32 %v3020_v35, %v3042_v8  ;;  %v857_v38 = vmul.f32 %v2968_v12, %v3015_v54  ;;  %v860_v46 = vmul.f32 %v2968_v12, %v3017_v55 }
 0x229   : > { %912 = vrot.lane.b32.xlu0 %v879_v56, %s2506_s3  ;;  %v814_v22 = vpack.c.bf16 %v806_v4, %v804_v1  ;;  %v1254_v28 = vsel %vm1253_vm5, %v2282_v21, %v2927_v49  ;;  %v858_v36 = vmul.f32 %v853_v23, %v3040_v7  ;;  %v861_v41 = vmul.f32 %v853_v23, %v3042_v8 }
 0x22a   : > { %v815_v13 = vpack.c.bf16 %v3055_v16, %v3051_v15  ;;  %v872_v27 = vpack.c.bf16 %v860_v46, %v857_v38  ;;  %v1271_v32 = vmul.f32 %v1254_v28, %v2978_v34  ;;  %v1134_v42 = vmul.f32 %v2996_v26, %v2896_v31 }
 0x22b   : > { %986 = vmatpush.bf16.msra.mxu3 %v814_v22  ;;  %v873_v12 = vpack.c.bf16 %v861_v41, %v858_v36  ;;  %v1126_v56 = vmul.f32 %v2989_v51, %v2971_v25  ;;  %v1129_v23 = vmul.f32 %v2989_v51, %v2973_v33  ;;  %v1270_v47 = vmul.f32 %v2282_v21, %v2905_v37 }
 0x22c   : > { %v1280_v48 = vpack.c.bf16 %v1271_v32, %v1271_v32  ;;  %v1143_v30 = vpack.c.bf16 %v1134_v42, %v1134_v42  ;;  %v1128_v63 = vmul.f32 %v2996_v26, %v2929_v50  ;;  %v1120_v1 = vmul.f32 %v2989_v51, %v3015_v54 }
 0x22d   : > { %1173 = vrot.lane.b32.xlu2 %v1141_v17, %s2507_s4  ;;  %904 = vrot.lane.b32.xlu1 %v875_v10, %s2506_s3  ;;  %v1279_v19 = vpack.c.bf16 %v1270_v47, %v1270_v47  ;;  %v1123_v4 = vmul.f32 %v2989_v51, %v3017_v55  ;;  %v1131_v22 = vmul.f32 %v2996_v26, %v2931_v52 }
 0x22e   : > { %v1122_v37 = vmul.f32 %v2996_v26, %v2918_v43  ;;  %v1265_v51 = vmul.f32 %v1254_v28, %v2999_v59  ;;  %v1268_v10 = vmul.f32 %v1254_v28, %v3001_v40  ;;  %v1127_v52 = vmul.f32 %v3010_v24, %v2999_v59 }
 0x22f   : > { %v1135_v9 = vpack.c.bf16 %v1123_v4, %v1120_v1  ;;  %v1140_v50 = vpack.c.bf16 %v1131_v22, %v1128_v63  ;;  %v1130_v43 = vmul.f32 %v3010_v24, %v3001_v40  ;;  %v1258_v38 = vmul.f32 %v2282_v21, %v3015_v54 }
 0x230   : > { %v1261_v59 = vmul.f32 %v2282_v21, %v3017_v55  ;;  %v1121_v40 = vmul.f32 %v3010_v24, %v3040_v7  ;;  %v1124_v46 = vmul.f32 %v3010_v24, %v3042_v8  ;;  %v1259_v24 = vmul.f32 %v1254_v28, %v3040_v7 }
 0x231   : > { %1175 = vrot.lane.b32.xlu0 %v1142_v18, %s2507_s4  ;;  %v1277_v18 = vpack.c.bf16 %v1268_v10, %v1265_v51  ;;  %v1139_v14 = vpack.c.bf16 %v1130_v43, %v1127_v52  ;;  %v1262_v55 = vmul.f32 %v1254_v28, %v3042_v8  ;;  %v813_v22 = vmul.f32 %v3020_v35, %v2978_v34 }
 0x235   : > { %906 = vrot.lane.b32.xlu2 %v876_v20, %s2506_s3  ;;  %898 = vrot.lane.b32.xlu1 %v872_v27, %s2506_s3  ;;  %v1272_v20 = vmul.f32 %v2927_v49, %v2896_v31 }
 0x237   : > { %v1281_v54 = vpack.c.bf16 %v1272_v20, %v1272_v20 }
 0x239   : > { %1025 = vrot.lane.b32.xlu0 %v2911_v39, %s2505_s18  ;;  %v1138_v39 = vpack.c.bf16 %v1129_v23, %v1126_v56 }
 0x23d   : > { %1313 = vrot.lane.b32.xlu1 %v1280_v48, %s2508_s19  ;;  %900 = vrot.lane.b32.xlu2 %v873_v12, %s2506_s3 }
 0x241   : > { %1177 = vrot.lane.b32.xlu0 %v1143_v30, %s2507_s4 }
 0x245   : > { %1167 = vrot.lane.b32.xlu1 %v1138_v39, %s2507_s4  ;;  %1023 = vrot.lane.b32.xlu2 %v768_v45, %s2505_s18  ;;  %v1125_v45 = vmul.f32 %v2996_v26, %v2921_v44  ;;  %v1264_v44 = vmul.f32 %v2282_v21, %v2971_v25  ;;  %v1267_v26 = vmul.f32 %v2282_v21, %v2973_v33 }
 0x246   : > { %v1273_v25 = vpack.c.bf16 %v1261_v59, %v1258_v38  ;;  %v1136_v33 = vpack.c.bf16 %v1124_v46, %v1121_v40  ;;  %v1274_v21 = vpack.c.bf16 %v1262_v55, %v1259_v24 }
 0x247   : > { %v1137_v17 = vpack.c.bf16 %v1125_v45, %v1122_v37  ;;  %v1276_v29 = vpack.c.bf16 %v1267_v26, %v1264_v44 }
 0x249   : > { %1311 = vrot.lane.b32.xlu0 %v1279_v19, %s2508_s19 }
 0x24d   : > { %1161 = vrot.lane.b32.xlu1 %v1135_v9, %s2507_s4  ;;  %1171 = vrot.lane.b32.xlu2 %v1140_v50, %s2507_s4  ;;  %v2168_v50 = vld [vmem:[#allocation8 + $0x8] sm:$0xff] }
 0x251   : > { %1165 = vrot.lane.b32.xlu0 %v1137_v17, %s2507_s4  ;;  %v819_v17 = vpack.c.bf16 %v813_v22, %v813_v22 }
 0x253   : > { %v977_v34 = vsel %vm494_vm0, %v819_v17, 0 }
 0x255   : > { %1307 = vrot.lane.b32.xlu1 %v1277_v18, %s2508_s19  ;;  %1169 = vrot.lane.b32.xlu2 %v1139_v14, %s2507_s4  ;;  %v2169_v18 = vld [vmem:[#allocation8 + $0x10] sm:$0xff] }
 0x259   : > { %1305 = vrot.lane.b32.xlu0 %v1276_v29, %s2508_s19 }
 0x25d   : > { %1299 = vrot.lane.b32.xlu1 %v1273_v25, %s2508_s19  ;;  %1163 = vrot.lane.b32.xlu2 %v1136_v33, %s2507_s4  ;;  %s2509_s4 = smov 17  }
 0x25f   : > { %v1034_v31 = vpop.permute.xlu2 %1033 }
 0x261   : > { %1309 = vrot.lane.b32.xlu0 %v1278_v61, %s2508_s19 }
 0x265   : > { %1303 = vrot.lane.b32.xlu1 %v1275_v3, %s2508_s19  ;;  %1315 = vrot.lane.b32.xlu2 %v1281_v54, %s2508_s19  ;;  %v3140_v3 = vld [vmem:[#allocation8] sm:$0xff] }
 0x266   : > { %2122 = vmatmul.msk.bf16.vlgmr.msra.gmra.mxu3 %vm927_vm7, %v3140_v3 }
 0x26d   : > { %1301 = vrot.lane.b32.xlu2 %v1274_v21, %s2508_s19 }
 0x275   : > { %v1038_v27 = vpop.permute.xlu1 %1037 }
 0x277   : > { %v1028_v49 = vpop.permute.xlu2 %1027 }
 0x27b   : > { %v915_v57 = vpop.permute.xlu0 %914 }
 0x27d   : > { %v1032_v0 = vpop.permute.xlu1 %1031 }
 0x27f   : > { %v911_v62 = vpop.permute.xlu2 %910 }
 0x283   : > { %v1036_v61 = vpop.permute.xlu0 %1035 }
 0x284   : > { %v1045_v32 = vsel %vm1039_vm6, %v1036_v61, %v1038_v27  ;;  %v1044_v45 = vsel %vm1039_vm6, %v1034_v31, %v1036_v61 }
 0x285   : > { %v1057_v2 = vsel %vm494_vm0, %v1045_v32, 0  ;;  %v903_v28 = vpop.permute.xlu1 %902  ;;  %v1054_v51 = vsel %vm494_vm0, %v1044_v45, 0 }
 0x286   : > { %1078 = vmatpush.bf16.msrb.mxu3 %v1057_v2 }
 0x287   : > { %v1174_v7 = vpop.permute.xlu2 %1173 }
 0x28b   : > { %v909_v8 = vpop.permute.xlu0 %908 }
 0x28f   : > { %v907_v36 = vpop.permute.xlu2 %906 }
 0x290   : > { %v920_v4 = vsel %vm916_vm8, %v907_v36, %v909_v8  ;;  %v2171_v8 = vld [vmem:[#allocation8 + $0x20] sm:$0xff] }
 0x293   : > { %v1030_v41 = vpop.permute.xlu0 %1029 }
 0x294   : > { %v1043_v48 = vsel %vm1039_vm6, %v1030_v41, %v1032_v0  ;;  %v1042_v35 = vsel %vm1039_vm6, %v1028_v49, %v1030_v41 }
 0x295   : > { %1079 = vmatpush.bf16.msrb.mxu3 %v1043_v48 }
 0x297   : > { %v1022_v12 = vpop.permute.xlu1 %1021  ;;  %v901_v42 = vpop.permute.xlu2 %900 }
 0x298   : > { %v918_v9 = vsel %vm916_vm8, %v901_v42, %v903_v28 }
 0x29b   : > { %v913_v30 = vpop.permute.xlu0 %912 }
 0x29c   : > { %v921_v56 = vsel %vm916_vm8, %v911_v62, %v913_v30  ;;  %v922_v23 = vsel %vm916_vm8, %v913_v30, %v915_v57  ;;  %v2170_v62 = vld [vmem:[#allocation8 + $0x18] sm:$0xff] }
 0x29d   : > { %v932_v39 = vsel %vm494_vm0, %v921_v56, 0  ;;  %v935_v47 = vsel %vm494_vm0, %v922_v23, 0 }
 0x29e   : > { %942 = vmatpush.bf16.msra.mxu1 %v932_v39  ;;  %956 = vmatpush.bf16.msra.mxu2 %v935_v47 }
 0x29f   : > { %v905_v63 = vpop.permute.xlu1 %904  ;;  %v1024_v19 = vpop.permute.xlu2 %1023 }
 0x2a0   : > { %v919_v1 = vsel %vm916_vm8, %v905_v63, %v907_v36  ;;  %v1040_v14 = vsel %vm1039_vm6, %v1022_v12, %v1024_v19 }
 0x2a2   : > { %943 = vmatpush.bf16.msra.mxu1 %v919_v1  ;;  %957 = vmatpush.bf16.msra.mxu2 %v920_v4 }
 0x2a3   : > { %v1176_v37 = vpop.permute.xlu0 %1175 }
 0x2a4   : > { %v1184_v29 = vsel %vm1179_vm9, %v1174_v7, %v1176_v37 }
 0x2a5   : > { %v1194_v40 = vsel %vm494_vm0, %v1184_v29, 0 }
 0x2a6   : > { %958 = vmatpush.bf16.msra.mxu2 %v918_v9 }
 0x2a7   : > { %v899_v10 = vpop.permute.xlu1 %898  ;;  %v1172_v52 = vpop.permute.xlu2 %1171 }
 0x2a8   : > { %v917_v43 = vsel %vm916_vm8, %v899_v10, %v901_v42 }
 0x2a9   : > { %944 = vmatpush.bf16.msra.mxu1 %v917_v43  ;;  %2117 = vmatmul.msk.bf16.vlgmr.msra.gmra.mxu2 %vm927_vm7, %v2168_v50 }
 0x2aa   : > { %1064 = vmatpush.bf16.msrb.mxu2 %v1054_v51 }
 0x2ab   : > { %v1026_v44 = vpop.permute.xlu0 %1025 }
 0x2ac   : > { %2116 = vmatmul.msk.bf16.vlgmr.msra.gmra.mxu1 %vm927_vm7, %v2168_v50  ;;  %v1041_v26 = vsel %vm1039_vm6, %v1024_v19, %v1026_v44 }
 0x2ad   : > { %998 = vmatpush.bf16.msrb.mxu1 %v977_v34  ;;  %1080 = vmatpush.bf16.msrb.mxu3 %v1041_v26 }
 0x2ae   : > { %1065 = vmatpush.bf16.msrb.mxu2 %v1042_v35 }
 0x2af   : > { %v1314_v38 = vpop.permute.xlu1 %1313  ;;  %v1170_v59 = vpop.permute.xlu2 %1169 }
 0x2b0   : > { %2129 = vmatmul.msk.bf16.vlgmr.msrb.gmra.mxu3 %vm927_vm7, %v2169_v18  ;;  %v1183_v20 = vsel %vm1179_vm9, %v1170_v59, %v1172_v52 }
 0x2b1   : > { %999 = vmatpush.bf16.msrb.mxu1 %v817_v11 }
 0x2b2   : > { %1066 = vmatpush.bf16.msrb.mxu2 %v1040_v14 }
 0x2b3   : > { %v1178_v46 = vpop.permute.xlu0 %1177 }
 0x2b4   : > { %v1185_v5 = vsel %vm1179_vm9, %v1176_v37, %v1178_v46 }
 0x2b5   : > { %1000 = vmatpush.bf16.msrb.mxu1 %v815_v13  ;;  %v1197_v6 = vsel %vm494_vm0, %v1185_v5, 0  ;;  %v1369_v13 = vld [vmem:[%s3456_s5] sm:$0xff] }
 0x2b6   : > { %1218 = vmatpush.bf16.msra.mxu2 %v1197_v6  ;;  %1373 = vperm.xlu2 %2284, %v1369_v13   ;;  %v1388_v5 = vld [vmem:[%s447_s8] sm:$0xff] }
 0x2b7   : > { %v1168_v11 = vpop.permute.xlu1 %1167  ;;  %v1164_v25 = vpop.permute.xlu2 %1163 }
 0x2b8   : > { %v1182_v33 = vsel %vm1179_vm9, %v1168_v11, %v1170_v59 }
 0x2b9   : > { %1204 = vmatpush.bf16.msra.mxu1 %v1194_v40  ;;  %2128 = vmatmul.msk.bf16.vlgmr.msrb.gmra.mxu2 %vm927_vm7, %v2169_v18 }
 0x2ba   : > { %1219 = vmatpush.bf16.msra.mxu2 %v1183_v20  ;;  %v1395_v20 = vunpack.c.l.b16 %v1388_v5 }
 0x2bb   : > { %v1312_v15 = vpop.permute.xlu0 %1311 }
 0x2bc   : > { %v1322_v16 = vsel %vm1317_vm10, %v1312_v15, %v1314_v38  ;;  %2123 = vmatmul.msk.bf16.vlgmr.msrb.gmra.mxu1 %vm927_vm7, %v3140_v3 }
 0x2bd   : > { %1205 = vmatpush.bf16.msra.mxu1 %v1182_v33  ;;  %v1332_v54 = vsel %vm494_vm0, %v1322_v16, 0  ;;  %v1396_v33 = vunpack.c.h.b16 %v1388_v5 }
 0x2be   : > { %1342 = vmatpush.bf16.msra.mxu3 %v1332_v54 }
 0x2bf   : > { %v1162_v24 = vpop.permute.xlu1 %1161  ;;  %v1316_v55 = vpop.permute.xlu2 %1315  ;;  %v1398_v54 = vpack.c.b16 %v1396_v33, %v1396_v33 }
 0x2c0   : > { %v1323_v21 = vsel %vm1317_vm10, %v1314_v38, %v1316_v55  ;;  %v1180_v31 = vsel %vm1179_vm9, %v1162_v24, %v1164_v25  ;;  %v1397_v24 = vpack.c.b16 %v1395_v20, %v1395_v20 }
 0x2c1   : > { %v1335_v49 = vsel %vm494_vm0, %v1323_v21, 0  ;;  %1206 = vmatpush.bf16.msra.mxu1 %v1180_v31 }
 0x2c3   : > { %v1166_v27 = vpop.permute.xlu0 %1165 }
 0x2c4   : > { %v1181_v57 = vsel %vm1179_vm9, %v1164_v25, %v1166_v27 }
 0x2c5   : > { %1356 = vmatpush.bf16.msrb.mxu1 %v1335_v49  ;;  %1220 = vmatpush.bf16.msra.mxu2 %v1181_v57 }
 0x2c7   : > { %v1308_v61 = vpop.permute.xlu1 %1307  ;;  %v1302_v2 = vpop.permute.xlu2 %1301 }
 0x2c9   : > { %2135 = vmatmul.msk.bf16.vlgmr.msra.gmra.mxu2 %vm927_vm7, %v2170_v62 }
 0x2cb   : > { %v1306_v32 = vpop.permute.xlu0 %1305 }
 0x2cc   : > { %2134 = vmatmul.msk.bf16.vlgmr.msra.gmra.mxu1 %vm927_vm7, %v2170_v62  ;;  %v1320_v0 = vsel %vm1317_vm10, %v1306_v32, %v1308_v61 }
 0x2cd   : > { %1343 = vmatpush.bf16.msra.mxu3 %v1320_v0 }
 0x2cf   : > { %v1300_v3 = vpop.permute.xlu1 %1299 }
 0x2d0   : > { %v1318_v7 = vsel %vm1317_vm10, %v1300_v3, %v1302_v2 }
 0x2d1   : > { %1344 = vmatpush.bf16.msra.mxu3 %v1318_v7 }
 0x2d3   : > { %v1310_v28 = vpop.permute.xlu0 %1309 }
 0x2d4   : > { %2140 = vmatmul.msk.bf16.vlgmr.msra.gmra.mxu3 %vm927_vm7, %v2171_v8  ;;  %v1321_v36 = vsel %vm1317_vm10, %v1308_v61, %v1310_v28 }
 0x2d5   : > { %1357 = vmatpush.bf16.msrb.mxu1 %v1321_v36 }
 0x2d7   : > { %v1304_v41 = vpop.permute.xlu1 %1303 }
 0x2d8   : > { %v1319_v48 = vsel %vm1317_vm10, %v1302_v2, %v1304_v41 }
 0x2d9   : > { %1358 = vmatpush.bf16.msrb.mxu1 %v1319_v48 }
 0x2dc   : > { %2141 = vmatmul.msk.bf16.vlgmr.msrb.gmra.mxu1 %vm927_vm7, %v2171_v8 }
 0x2e9   : > { %v988_v12 = vpop.f32.mrf.mxu3 }
 0x2f1   : > { %v990_v56 = vpop.f32.mrf.mxu3 }
 0x310   : > { %v1374_v14 = vpop.permute.xlu2 %1373 }
 0x329   : > { %v946_v42 = vpop.f32.mrf.mxu1 }
 0x32a   : > { %v989_v10 = vadd.f32 %v988_v12, %v946_v42 }
 0x32c   : > { %v960_v30 = vpop.f32.mrf.mxu2 }
 0x331   : > { %v948_v23 = vpop.f32.mrf.mxu1 }
 0x332   : > { %v991_v39 = vadd.f32 %v990_v56, %v948_v23 }
 0x333   : > { %v1082_v63 = vpop.f32.mrf.mxu3 }
 0x334   : > { %v962_v47 = vpop.f32.mrf.mxu2 }
 0x339   : > { %v1002_v19 = vpop.f32.mrf.mxu1 }
 0x33a   : > { %v1003_v52 = vadd.f32 %v1002_v19, %v960_v30 }
 0x33b   : > { %v1084_v22 = vpop.f32.mrf.mxu3 }
 0x33c   : > { %v1068_v1 = vpop.f32.mrf.mxu2  ;;  %v1088_v44 = vadd.f32 %v1082_v63, %v1003_v52 }
 0x33d   : > { %v1087_v34 = vadd.f32 %v1068_v1, %v989_v10 }
 0x341   : > { %v1004_v4 = vpop.f32.mrf.mxu1 }
 0x342   : > { %v1005_v37 = vadd.f32 %v1004_v4, %v962_v47 }
 0x344   : > { %v3196_v45 = vadd.f32 %v1084_v22, %v1005_v37  ;;  %v1070_v9 = vpop.f32.mrf.mxu2 }
 0x345   : > { %v1089_v50 = vadd.f32 %v1070_v9, %v991_v39 }
 0x349   : > { %v1208_v17 = vpop.f32.mrf.mxu1 }
 0x34a   : > { %v1227_v26 = vadd.f32 %v1208_v17, %v1087_v34 }
 0x34c   : > { %v1222_v35 = vpop.f32.mrf.mxu2 }
 0x34d   : > { %v1228_v29 = vadd.f32 %v1222_v35, %v1088_v44 }
 0x351   : > { %v1210_v51 = vpop.f32.mrf.mxu1 }
 0x352   : > { %v3200_v43 = vadd.f32 %v1210_v51, %v1089_v50 }
 0x357   : > { %v1346_v18 = vpop.f32.mrf.mxu3 }
 0x358   : > { %v1365_v38 = vadd.f32 %v1346_v18, %v1227_v26 }
 0x359   : > { %v1360_v59 = vpop.f32.mrf.mxu1 }
 0x35a   : > { %v1366_v40 = vadd.f32 %v1360_v59, %v1228_v29  ;;  %v1381_v46 = vadd.f32 %v1374_v14, %v1365_v38 }
 0x35c   : > { %v1382_v6 = vadd.f32 %v1374_v14, %v1366_v40  ;;  %v1385_v11 = vmax.f32 %v1381_v46, 0.0 }
 0x35e   : > { %v1386_v25 = vmax.f32 %v1382_v6, 0.0 }
 0x360   : > { %v1387_v15 = vpack.c.bf16 %v1386_v25, %v1385_v11 }
 0x362   : > { %v1390_v16 = vunpack.c.l.b16 %v1387_v15  ;;  %v1391_v13 = vunpack.c.h.b16 %v1387_v15 }
 0x364   : > { %v1393_v55 = vpack.c.b16 %v1391_v13, %v1391_v13  ;;  %v1392_v21 = vpack.c.b16 %v1390_v16, %v1390_v16 }
 0x366   : > { %v1404_v31 = vsel %vm494_vm0, %v1393_v55, %v1398_v54  ;;  %v1401_v49 = vsel %vm494_vm0, %v1392_v21, %v1397_v24 }
 0x367   : > { %1409 = vrot.lane.b32.xlu1 %v1404_v31, %s2509_s4  ;;  %1407 = vrot.lane.b32.xlu0 %v1401_v49, %s2509_s4 }
 0x3d9   : > { %v1410_v27 = vpop.permute.xlu1 %1409  ;;  %v1408_v57 = vpop.permute.xlu0 %1407 }
 0x3da   : > { %v3210_v62 = vsel %vm1411_vm11, %v1410_v27, 0  ;;  %v3213_v61 = vsel %vm1411_vm11, %v1408_v57, %v1410_v27  ;;  %v3216_v32 = vsel %vm1411_vm11, 0, %v1408_v57 }
 0x3db   : > { %1438 = vrot.lane.b32.xlu1 %v3210_v62, %s2500_s26  ;;  %1434 = vrot.lane.b32.xlu2 %v3216_v32, %s2500_s26  ;;  %v1444_v37 = vunpack.c.l.bf16 %v3216_v32  ;;  %v1446_v17 = vunpack.c.h.bf16 %v3216_v32  ;;  %v1445_v51 = vunpack.c.l.bf16 %v3213_v61  ;;  %v1447_v10 = vunpack.c.h.bf16 %v3213_v61 }
 0x3dc   : > { %1436 = vrot.lane.b32.xlu0 %v3213_v61, %s2500_s26 }
 0x3dd   : > { %v1456_v33 = vmul.f32 %v1444_v37, %v2862_v58  ;;  %v1458_v20 = vmul.f32 %v1446_v17, %v2862_v58  ;;  %v1457_v13 = vmul.f32 %v1445_v51, %v2864_v60  ;;  %v1459_v54 = vmul.f32 %v1447_v10, %v2864_v60 }
 0x3df   : > { %v1468_v27 = vpack.c.bf16 %v1458_v20, %v1456_v33  ;;  %v1469_v57 = vpack.c.bf16 %v1459_v54, %v1457_v13 }
 0x3e3   : > { %1428 = vrot.lane.b32.xlu1 %v3210_v62, %s2504_s12  ;;  %1424 = vrot.lane.b32.xlu2 %v3216_v32, %s2504_s12 }
 0x3e4   : > { %1426 = vrot.lane.b32.xlu0 %v3213_v61, %s2504_s12 }
 0x3eb   : > { %2286 = vrot.lane.b32.xlu2 %v2859_v53, %s2495_s21  ;;  %1479 = vrot.lane.b32.xlu1 %v3213_v61, %s2506_s3  ;;  %s2172_s21 = sshll.u32 %s2586_s17, 4  ;;  %s1948_s17 = scalar_lea.sflag [#allocation5], %s2683_s25 }
 0x3ec   : > { %1477 = vrot.lane.b32.xlu0 %v3216_v32, %s2506_s3  ;;  %s1959_s29 = scalar_lea.hbm %s3461_s10, %s2172_s21 }
 0x3ed   : > { %s1963_s23 = sshll.u32 %s1959_s29, 4  ;;  %s1964_s23 = int_to_ptr.hbm [resolvable:$true] %s1963_s23 }
 0x3ee   : > { %s2426_s30 = sshra.s32 %s1964_s23, 4  ;;  %s2427_s30 = int_to_ptr.hbm [resolvable:$true] %s2426_s30 }
 0x3ef   : > { %s2428_s11 = scalar_lea.hbm %s2427_s30, 16  ;;  %p2433_p10 = scmp.lt.s32.totalorder %s2427_s30, %s3461_s10 }
 0x3f0   : > { %p2429_p4 = scmp.ne.s32.totalorder %s2427_s30, %s2428_s11 }
 0x3f2   : > { %p2430_p8 = pnand %p2429_p4, %p2653_p3 }
 0x3f3   : > { %1481 = vrot.lane.b32.xlu2 %v3210_v62, %s2506_s3 }
 0x3f4   : > { %p2431_p9 = pneg %p2430_p8 }
 0x435   : > { %v1435_v0 = vpop.permute.xlu2 %1434 }
 0x43d   : > { %v1425_v2 = vpop.permute.xlu2 %1424 }
 0x445   : > { %v2287_v7 = vpop.permute.xlu2 %2286 }
 0x446   : > { %v3243_v42 = vunpack.i.h.bf16 %v2287_v7  ;;  %v3245_v30 = vunpack.i.l.bf16 %v2287_v7 }
 0x448   : > { %v3254_v50 = vsel %vm1578_vm12, %v3245_v30, %v3243_v42 }
 0x44d   : > { %v1439_v3 = vpop.permute.xlu1 %1438 }
 0x44e   : > { %v1437_v8 = vpop.permute.xlu0 %1436  ;;  %1493 = vrot.lane.b32.xlu2 %v1439_v3, %s2506_s3  ;;  %v1572_v63 = vunpack.c.l.bf16 %v1439_v3  ;;  %v1573_v19 = vunpack.c.h.bf16 %v1439_v3 }
 0x44f   : > { %v1441_v28 = vsel %vm739_vm15, %v1437_v8, %v1439_v3  ;;  %v1440_v53 = vsel %vm739_vm15, %v1435_v0, %v1437_v8 }
 0x450   : > { %1491 = vrot.lane.b32.xlu1 %v1441_v28, %s2506_s3  ;;  %v1453_v36 = vunpack.c.l.bf16 %v1441_v28  ;;  %v1455_v41 = vunpack.c.h.bf16 %v1441_v28  ;;  %1489 = vrot.lane.b32.xlu0 %v1440_v53, %s2506_s3  ;;  %v1452_v48 = vunpack.c.l.bf16 %v1440_v53  ;;  %v1454_v12 = vunpack.c.h.bf16 %v1440_v53 }
 0x451   : > { %v1597_v35 = vmul.f32 %v3243_v42, %v1572_v63  ;;  %v1600_v44 = vmul.f32 %v3243_v42, %v1573_v19  ;;  %v1587_v63 = vmul.f32 %v3254_v50, %v1447_v10 }
 0x452   : > { %v1465_v56 = vmul.f32 %v1453_v36, %v2864_v60  ;;  %v1467_v23 = vmul.f32 %v1455_v41, %v2864_v60  ;;  %v1464_v39 = vmul.f32 %v1452_v48, %v2862_v58  ;;  %v1466_v47 = vmul.f32 %v1454_v12, %v2862_v58 }
 0x453   : > { %v1596_v38 = vmul.f32 %v3254_v50, %v1453_v36  ;;  %v1599_v59 = vmul.f32 %v3254_v50, %v1455_v41  ;;  %v1595_v40 = vmul.f32 %v3245_v30, %v1452_v48  ;;  %v1598_v46 = vmul.f32 %v3245_v30, %v1454_v12 }
 0x454   : > { %v1472_v1 = vpack.c.bf16 %v1466_v47, %v1464_v39  ;;  %v1473_v4 = vpack.c.bf16 %v1467_v23, %v1465_v56  ;;  %v1609_v21 = vpack.c.bf16 %v1600_v44, %v1597_v35  ;;  %v1568_v41 = vunpack.c.l.bf16 %v3210_v62  ;;  %v1682_v35 = vld [vmem:[%s3458_s7] sm:$0xff] }
 0x455   : > { %v1429_v22 = vpop.permute.xlu1 %1428  ;;  %v1608_v31 = vpack.c.bf16 %v1599_v59, %v1596_v38  ;;  %v1607_v49 = vpack.c.bf16 %v1598_v46, %v1595_v40  ;;  %v1569_v48 = vunpack.c.h.bf16 %v3210_v62  ;;  %v1583_v23 = vmul.f32 %v3245_v30, %v1444_v37  ;;  %v1474_v37 = vld [vmem:[%s3457_s6] sm:$0xf]  ;;  %v2142_v40 = vld [vmem:[%s3457_s6 + $0x4] sm:$0xf] }
 0x456   : > { %1545 = vmatpush.bf16.msrb.mxu0 %v1472_v1  ;;  %1558 = vmatpush.bf16.msra.mxu1 %v1473_v4  ;;  %v1427_v9 = vpop.permute.xlu0 %1426  ;;  %v1570_v24 = vunpack.c.l.bf16 %v1429_v22  ;;  %v1571_v55 = vunpack.c.h.bf16 %v1429_v22  ;;  %v1585_v12 = vmul.f32 %v3243_v42, %v1568_v41  ;;  %v1586_v39 = vmul.f32 %v3245_v30, %v1446_v17  ;;  %v1482_v4 = vpop.permute.xlu2 %1481 }
 0x457   : > { %1487 = vrot.lane.b32.xlu2 %v1429_v22, %s2506_s3  ;;  %v1431_v52 = vsel %vm730_vm3, %v1427_v9, %v1429_v22  ;;  %v1430_v34 = vsel %vm730_vm3, %v1425_v2, %v1427_v9  ;;  %v1588_v56 = vmul.f32 %v3243_v42, %v1569_v48  ;;  %v1584_v47 = vmul.f32 %v3254_v50, %v1445_v51 }
 0x458   : > { %1485 = vrot.lane.b32.xlu1 %v1431_v52, %s2506_s3  ;;  %v1449_v26 = vunpack.c.l.bf16 %v1431_v52  ;;  %v1451_v18 = vunpack.c.h.bf16 %v1431_v52  ;;  %1483 = vrot.lane.b32.xlu0 %v1430_v34, %s2506_s3  ;;  %v1448_v14 = vunpack.c.l.bf16 %v1430_v34  ;;  %v1450_v29 = vunpack.c.h.bf16 %v1430_v34 }
 0x459   : > { %v1591_v61 = vmul.f32 %v3243_v42, %v1570_v24  ;;  %v1594_v0 = vmul.f32 %v3243_v42, %v1571_v55  ;;  %v1603_v19 = vpack.c.bf16 %v1588_v56, %v1585_v12  ;;  %v1601_v62 = vpack.c.bf16 %v1586_v39, %v1583_v23 }
 0x45a   : > { %v1460_v5 = vmul.f32 %v1448_v14, %v2862_v58  ;;  %v1462_v6 = vmul.f32 %v1450_v29, %v2862_v58  ;;  %v1461_v11 = vmul.f32 %v1449_v26, %v2864_v60  ;;  %v1463_v25 = vmul.f32 %v1451_v18, %v2864_v60 }
 0x45b   : > { %v1590_v2 = vmul.f32 %v3254_v50, %v1449_v26  ;;  %v1593_v3 = vmul.f32 %v3254_v50, %v1451_v18  ;;  %v1589_v7 = vmul.f32 %v3245_v30, %v1448_v14  ;;  %v1592_v8 = vmul.f32 %v3245_v30, %v1450_v29 }
 0x45c   : > { %v1470_v15 = vpack.c.bf16 %v1462_v6, %v1460_v5  ;;  %v1471_v16 = vpack.c.bf16 %v1463_v25, %v1461_v11  ;;  %v1606_v28 = vpack.c.bf16 %v1594_v0, %v1591_v61  ;;  %v1602_v1 = vpack.c.bf16 %v1587_v63, %v1584_v47 }
 0x45d   : > { %v1605_v53 = vpack.c.bf16 %v1593_v3, %v1590_v2  ;;  %v1604_v36 = vpack.c.bf16 %v1592_v8, %v1589_v7  ;;  %v1480_v32 = vpop.permute.xlu1 %1479  ;;  %v3337_v2 = vpop.f32.mrf.mxu2 }
 0x45e   : > { %1546 = vmatpush.bf16.msrb.mxu0 %v1470_v15  ;;  %1559 = vmatpush.bf16.msra.mxu1 %v1471_v16  ;;  %v1478_v9 = vpop.permute.xlu0 %1477  ;;  %v1496_v59 = vsel %vm916_vm8, %v1480_v32, %v1482_v4  ;;  %v3339_v3 = vpop.f32.mrf.mxu3 }
 0x45f   : > { %1637 = vrot.lane.b32.xlu2 %v1609_v21, %s2505_s18  ;;  %v1495_v38 = vsel %vm916_vm8, %v1478_v9, %v1480_v32 }
 0x460   : > { %1635 = vrot.lane.b32.xlu1 %v1608_v31, %s2505_s18  ;;  %1633 = vrot.lane.b32.xlu0 %v1607_v49, %s2505_s18  ;;  %v2147_v31 = vld [vmem:[%s3457_s6 + $0x8] sm:$0xf]  ;;  %v3335_v49 = vpop.f32.mrf.mxu1 }
 0x462   : > { %1547 = vmatpush.bf16.msrb.mxu0 %v1468_v27  ;;  %1560 = vmatpush.bf16.msra.mxu1 %v1469_v57 }
 0x465   : > { %2145 = vmatmul.msk.bf16.vlgmr.msrb.gmra.mxu0 %vm1507_vm13, %v1474_v37  ;;  %2146 = vmatmul.msk.bf16.vlgmr.msra.gmra.mxu1 %vm1507_vm13, %v1474_v37 }
 0x467   : > { %1631 = vrot.lane.b32.xlu2 %v1606_v28, %s2505_s18 }
 0x468   : > { %1629 = vrot.lane.b32.xlu1 %v1605_v53, %s2505_s18  ;;  %1627 = vrot.lane.b32.xlu0 %v1604_v36, %s2505_s18 }
 0x46f   : > { %1625 = vrot.lane.b32.xlu2 %v1603_v19, %s2505_s18 }
 0x470   : > { %1621 = vrot.lane.b32.xlu0 %v1601_v62, %s2505_s18  ;;  %1623 = vrot.lane.b32.xlu1 %v1602_v1, %s2505_s18 }
 0x478   : > { %1685 = vperm.xlu0 %2290, %v1682_v35  }
 0x4a8   : > { %v1494_v22 = vpop.permute.xlu2 %1493 }
 0x4b1   : > { %v1488_v10 = vpop.permute.xlu2 %1487 }
 0x4b9   : > { %v1638_v29 = vpop.permute.xlu2 %1637 }
 0x4c1   : > { %v1632_v25 = vpop.permute.xlu2 %1631 }
 0x4c2   : > { %v1492_v17 = vpop.permute.xlu1 %1491  ;;  %v1490_v51 = vpop.permute.xlu0 %1489 }
 0x4c3   : > { %v1500_v52 = vsel %vm916_vm8, %v1492_v17, %v1494_v22  ;;  %v1499_v34 = vsel %vm916_vm8, %v1490_v51, %v1492_v17 }
 0x4c4   : > { %1516 = vmatpush.bf16.msrb.mxu2 %v1499_v34  ;;  %1529 = vmatpush.bf16.msrb.mxu3 %v1500_v52 }
 0x4c9   : > { %v1626_v13 = vpop.permute.xlu2 %1625 }
 0x4ca   : > { %v1486_v44 = vpop.permute.xlu1 %1485  ;;  %v1484_v26 = vpop.permute.xlu0 %1483 }
 0x4cb   : > { %v1497_v18 = vsel %vm916_vm8, %v1484_v26, %v1486_v44  ;;  %v1498_v14 = vsel %vm916_vm8, %v1486_v44, %v1488_v10 }
 0x4cc   : > { %1517 = vmatpush.bf16.msrb.mxu2 %v1497_v18  ;;  %1530 = vmatpush.bf16.msrb.mxu3 %v1498_v14 }
 0x4d0   : > { %1518 = vmatpush.bf16.msrb.mxu2 %v1495_v38  ;;  %1531 = vmatpush.bf16.msrb.mxu3 %v1496_v59 }
 0x4d2   : > { %v1636_v46 = vpop.permute.xlu1 %1635  ;;  %v1634_v5 = vpop.permute.xlu0 %1633 }
 0x4d3   : > { %v1644_v6 = vsel %vm1039_vm6, %v1636_v46, %v1638_v29  ;;  %v1643_v11 = vsel %vm1039_vm6, %v1634_v5, %v1636_v46  ;;  %2143 = vmatmul.msk.bf16.vlgmr.msrb.gmra.mxu2 %vm1507_vm13, %v2142_v40  ;;  %2144 = vmatmul.msk.bf16.vlgmr.msrb.gmra.mxu3 %vm1507_vm13, %v2142_v40 }
 0x4d4   : > { %1659 = vmatpush.bf16.msra.mxu2 %v1643_v11  ;;  %1672 = vmatpush.bf16.msra.mxu3 %v1644_v6 }
 0x4da   : > { %v1630_v33 = vpop.permute.xlu1 %1629  ;;  %v1628_v20 = vpop.permute.xlu0 %1627 }
 0x4db   : > { %v1641_v15 = vsel %vm1039_vm6, %v1628_v20, %v1630_v33  ;;  %v1642_v16 = vsel %vm1039_vm6, %v1630_v33, %v1632_v25 }
 0x4dc   : > { %1660 = vmatpush.bf16.msra.mxu2 %v1641_v15  ;;  %1673 = vmatpush.bf16.msra.mxu3 %v1642_v16 }
 0x4e2   : > { %v1622_v54 = vpop.permute.xlu0 %1621  ;;  %v1624_v24 = vpop.permute.xlu1 %1623 }
 0x4e3   : > { %v1639_v55 = vsel %vm1039_vm6, %v1622_v54, %v1624_v24  ;;  %v1640_v21 = vsel %vm1039_vm6, %v1624_v24, %v1626_v13  ;;  %v1549_v27 = vpop.f32.mrf.mxu0  ;;  %v1562_v57 = vpop.f32.mrf.mxu1 }
 0x4e4   : > { %1661 = vmatpush.bf16.msra.mxu2 %v1639_v55  ;;  %1674 = vmatpush.bf16.msra.mxu3 %v1640_v21 }
 0x4e7   : > { %2148 = vmatmul.msk.bf16.vlgmr.msra.gmra.mxu2 %vm1507_vm13, %v2147_v31  ;;  %2149 = vmatmul.msk.bf16.vlgmr.msra.gmra.mxu3 %vm1507_vm13, %v2147_v31 }
 0x4ea   : > { %v1686_v48 = vpop.permute.xlu0 %1685 }
 0x4eb   : > { %v1551_v61 = vpop.f32.mrf.mxu0  ;;  %v1564_v0 = vpop.f32.mrf.mxu1 }
 0x556   : > { %v1520_v7 = vpop.f32.mrf.mxu2  ;;  %v1533_v8 = vpop.f32.mrf.mxu3 }
 0x557   : > { %v1550_v36 = vadd.f32 %v1549_v27, %v1520_v7  ;;  %v1563_v41 = vadd.f32 %v1562_v57, %v1533_v8 }
 0x55e   : > { %v1522_v28 = vpop.f32.mrf.mxu2  ;;  %v1535_v53 = vpop.f32.mrf.mxu3 }
 0x56a   : > { %v1663_v12 = vpop.f32.mrf.mxu2  ;;  %v1676_v56 = vpop.f32.mrf.mxu3 }
 0x56b   : > { %v1680_v23 = vadd.f32 %v1663_v12, %v1550_v36  ;;  %v1681_v39 = vadd.f32 %v1676_v56, %v1563_v41 }
 0x56d   : > { %v1688_v47 = vadd.f32 %v1686_v48, %v1680_v23  ;;  %v1689_v63 = vadd.f32 %v1686_v48, %v1681_v39 }
 0x56f   : > { %v1690_v19 = vmax.f32 %v1688_v47, 0.0  ;;  %v1691_v62 = vmax.f32 %v1689_v63, 0.0 }
 0x571   : > { %v1692_v1 = vpack.c.bf16 %v1691_v62, %v1690_v19 }
 0x572   : > { %v1665_v4 = vpop.f32.mrf.mxu2  ;;  %v1678_v22 = vpop.f32.mrf.mxu3 }
 0x573   : > { %v1695_v32 = vunpack.c.h.b16 %v1692_v1  ;;  %v1694_v9 = vunpack.c.l.b16 %v1692_v1 }
 0x575   : > { %v1697_v37 = vpack.c.b16 %v1695_v32, %v1695_v32  ;;  %v1696_v17 = vpack.c.b16 %v1694_v9, %v1694_v9 }
 0x577   : > { %1700 = vrot.lane.b32.xlu2 %v1697_v37, %s2509_s4  ;;  %1698 = vrot.lane.b32.xlu1 %v1696_v17, %s2509_s4 }
 0x5d1   : > { %v1701_v51 = vpop.permute.xlu2 %1700 }
 0x5d2   : > { %v1706_v10 = vsel %vm1411_vm11, %v1701_v51, 0 }
 0x5d3   : > { %1724 = vrot.lane.b32.xlu0 %v1706_v10, %s2500_s26  ;;  %v1711_v52 = vrot.slane %v1706_v10, 4 }
 0x5db   : > { %1716 = vrot.lane.b32.xlu0 %v1711_v52, %s2504_s12 }
 0x5e9   : > { %v1699_v34 = vpop.permute.xlu1 %1698 }
 0x5ea   : > { %v1704_v35 = vsel %vm1411_vm11, 0, %v1699_v34  ;;  %v1702_v44 = vsel %vm1411_vm11, %v1699_v34, %v1701_v51 }
 0x5eb   : > { %1720 = vrot.lane.b32.xlu1 %v1704_v35, %s2500_s26  ;;  %1722 = vrot.lane.b32.xlu2 %v1702_v44, %s2500_s26  ;;  %v1709_v26 = vrot.slane %v1704_v35, 4  ;;  %v1710_v18 = vrot.slane %v1702_v44, 4 }
 0x5f3   : > { %1712 = vrot.lane.b32.xlu1 %v1709_v26, %s2504_s12  ;;  %1714 = vrot.lane.b32.xlu2 %v1710_v18, %s2504_s12 }
 0x645   : > { %v1725_v14 = vpop.permute.xlu0 %1724  ;;  %v1723_v29 = vpop.permute.xlu2 %1722 }
 0x646   : > { %1771 = vrot.lane.b32.xlu0 %v1725_v14, %s2506_s3  ;;  %v1727_v38 = vsel %vm739_vm15, %v1723_v29, %v1725_v14  ;;  %v1854_v5 = vunpack.c.l.bf16 %v1725_v14  ;;  %v1757_v14 = vld [vmem:[#allocation9 + $0x4] sm:$0xf] }
 0x647   : > { %v1742_v59 = vunpack.c.l.bf16 %v1727_v38  ;;  %1769 = vrot.lane.b32.xlu2 %v1727_v38, %s2506_s3 }
 0x648   : > { %v1863_v54 = vmul.f32 %v3243_v42, %v1854_v5 }
 0x649   : > { %v1748_v40 = vmul.f32 %v1742_v59, %v2864_v60  ;;  %v1862_v21 = vmul.f32 %v1742_v59, %v3254_v50 }
 0x64a   : > { %v1869_v61 = vpack.c.bf16 %v1863_v54, %v1863_v54 }
 0x64b   : > { %v1752_v46 = vpack.c.bf16 %v1748_v40, %v1748_v40  ;;  %v1868_v0 = vpack.c.bf16 %v1862_v21, %v1862_v21 }
 0x64d   : > { %v1717_v6 = vpop.permute.xlu0 %1716  ;;  %v1715_v11 = vpop.permute.xlu2 %1714  ;;  %v1822_v25 = vsel %vm494_vm0, %v1752_v46, 0 }
 0x64e   : > { %v1719_v33 = vsel %vm730_vm3, %v1715_v11, %v1717_v6  ;;  %1843 = vmatpush.bf16.msrb.mxu3 %v1822_v25  ;;  %v1755_v20 = vsel %vm494_vm0, %v1706_v10, %v1717_v6  ;;  %v1370_v10 = vld [vmem:[%s3456_s5 + $0x8] sm:$0xff] }
 0x64f   : > { %1765 = vrot.lane.b32.xlu0 %v1755_v20, %s2506_s3  ;;  %v1735_v15 = vsel %vm494_vm0, %v1702_v44, %v1719_v33  ;;  %v1852_v27 = vunpack.c.l.bf16 %v1755_v20  ;;  %v1853_v57 = vunpack.c.h.bf16 %v1755_v20  ;;  %v1871_v20 = vld [vmem:[#allocation9 + $0x8] sm:$0xf] }
 0x650   : > { %1763 = vrot.lane.b32.xlu2 %v1735_v15, %s2506_s3  ;;  %v1738_v16 = vunpack.c.l.bf16 %v1735_v15  ;;  %v1740_v13 = vunpack.c.h.bf16 %v1735_v15 }
 0x651   : > { %v1857_v7 = vmul.f32 %v3243_v42, %v1852_v27  ;;  %v1860_v8 = vmul.f32 %v3243_v42, %v1853_v57 }
 0x652   : > { %v1744_v24 = vmul.f32 %v1738_v16, %v2864_v60  ;;  %v1746_v55 = vmul.f32 %v1740_v13, %v2864_v60  ;;  %v1856_v28 = vmul.f32 %v1738_v16, %v3254_v50  ;;  %v1859_v60 = vmul.f32 %v1740_v13, %v3254_v50  ;;  %v1933_v50 = vld [vmem:[%s3460_s9] sm:$0xff] }
 0x653   : > { %v1866_v36 = vpack.c.bf16 %v1860_v8, %v1857_v7 }
 0x654   : > { %v1750_v31 = vpack.c.bf16 %v1746_v55, %v1744_v24  ;;  %v1865_v48 = vpack.c.bf16 %v1859_v60, %v1856_v28  ;;  %v1230_v28 = vadd.f32 %v3337_v2, %v3196_v45 }
 0x656   : > { %1844 = vmatpush.bf16.msrb.mxu3 %v1750_v31 }
 0x657   : > { %1888 = vrot.lane.b32.xlu0 %v1869_v61, %s2505_s18 }
 0x658   : > { %1886 = vrot.lane.b32.xlu2 %v1868_v0, %s2505_s18 }
 0x65d   : > { %v1721_v53 = vpop.permute.xlu1 %1720 }
 0x65e   : > { %v1726_v41 = vsel %vm739_vm15, %v1721_v53, %v1723_v29 }
 0x65f   : > { %1882 = vrot.lane.b32.xlu0 %v1866_v36, %s2505_s18  ;;  %1767 = vrot.lane.b32.xlu1 %v1726_v41, %s2506_s3  ;;  %v1741_v12 = vunpack.c.l.bf16 %v1726_v41  ;;  %v1368_v36 = vadd.f32 %v3335_v49, %v1230_v28 }
 0x660   : > { %1880 = vrot.lane.b32.xlu2 %v1865_v48, %s2505_s18 }
 0x661   : > { %v1747_v56 = vmul.f32 %v1741_v12, %v2862_v58  ;;  %v1861_v22 = vmul.f32 %v3245_v30, %v1741_v12 }
 0x663   : > { %v1751_v23 = vpack.c.bf16 %v1747_v56, %v1747_v56  ;;  %v1867_v9 = vpack.c.bf16 %v1861_v22, %v1861_v22 }
 0x665   : > { %v1713_v42 = vpop.permute.xlu1 %1712  ;;  %v1819_v39 = vsel %vm494_vm0, %v1751_v23, 0 }
 0x666   : > { %v1718_v47 = vsel %vm730_vm3, %v1713_v42, %v1715_v11  ;;  %1830 = vmatpush.bf16.msrb.mxu2 %v1819_v39 }
 0x667   : > { %v1731_v63 = vsel %vm494_vm0, %v1704_v35, %v1718_v47 }
 0x668   : > { %1936 = vperm.xlu2 %2284, %v1933_v50   ;;  %1761 = vrot.lane.b32.xlu1 %v1731_v63, %s2506_s3  ;;  %v1737_v19 = vunpack.c.l.bf16 %v1731_v63  ;;  %v1739_v62 = vunpack.c.h.bf16 %v1731_v63  ;;  %v1367_v63 = vadd.f32 %v3339_v3, %v3200_v43  ;;  %s2432_s3 = scalar_lea.hbm %s3461_s10, 32 }
 0x669   : > { %p2434_p2 = scmp.lt.s32.totalorder %s2432_s3, %s2428_s11 }
 0x66a   : > { %v1743_v1 = vmul.f32 %v1737_v19, %v2862_v58  ;;  %v1745_v4 = vmul.f32 %v1739_v62, %v2862_v58  ;;  %v1855_v37 = vmul.f32 %v3245_v30, %v1737_v19  ;;  %v1858_v17 = vmul.f32 %v3245_v30, %v1739_v62  ;;  %v1753_v58 = vld [vmem:[#allocation9] sm:$0xf] }
 0x66b   : > { %2153 = vmatmul.msk.bf16.vlgmr.msrb.gmra.mxu3 %vm1779_vm14, %v1753_v58  ;;  %p2435_p11 = por %p2434_p2, %p2433_p10 }
 0x66c   : > { %v1749_v32 = vpack.c.bf16 %v1745_v4, %v1743_v1  ;;  %v1864_v51 = vpack.c.bf16 %v1858_v17, %v1855_v37 }
 0x66d   : > { %p2436_p12 = pnand %p2435_p11, %p2431_p9 }
 0x66e   : > { %1831 = vmatpush.bf16.msrb.mxu2 %v1749_v32 }
 0x670   : > { %1884 = vrot.lane.b32.xlu1 %v1867_v9, %s2505_s18 }
 0x671   : > { %2152 = vmatmul.msk.bf16.vlgmr.msrb.gmra.mxu2 %vm1779_vm14, %v1753_v58 }
 0x678   : > { %1878 = vrot.lane.b32.xlu1 %v1864_v51, %s2505_s18  ;;  %s2089_s18 = sshll.u32 %s2683_s25, 4 }
 0x679   : > { %s442_s4 = scalar_lea.vmem [#allocation11], %s2089_s18 }
 0x67a   : > { %s1961_s27 = sshll.u32 %s442_s4, 4  ;;  %s1962_s27 = int_to_ptr.vmem [resolvable:$true] %s1961_s27 }
 0x680   : > { %1378 = vperm.xlu1 %2291, %v1370_v10  }
 0x6a1   : > { %v1770_v52 = vpop.permute.xlu2 %1769 }
 0x6aa   : > { %v1764_v44 = vpop.permute.xlu2 %1763 }
 0x6b2   : > { %v1887_v29 = vpop.permute.xlu2 %1886 }
 0x6b8   : > { %v1772_v34 = vpop.permute.xlu0 %1771 }
 0x6b9   : > { %v1776_v35 = vsel %vm916_vm8, %v1770_v52, %v1772_v34 }
 0x6ba   : > { %v1787_v30 = vsel %vm494_vm0, %v1776_v35, 0  ;;  %v1881_v46 = vpop.permute.xlu2 %1880 }
 0x6bb   : > { %1808 = vmatpush.bf16.msrb.mxu1 %v1787_v30 }
 0x6c1   : > { %v1766_v26 = vpop.permute.xlu0 %1765 }
 0x6c2   : > { %v1774_v18 = vsel %vm916_vm8, %v1764_v44, %v1766_v26  ;;  %v1937_v48 = vpop.permute.xlu2 %1936 }
 0x6c3   : > { %1809 = vmatpush.bf16.msrb.mxu1 %v1774_v18 }
 0x6c6   : > { %2151 = vmatmul.msk.bf16.vlgmr.msrb.gmra.mxu1 %vm1779_vm14, %v1757_v14 }
 0x6c9   : > { %v1889_v38 = vpop.permute.xlu0 %1888 }
 0x6ca   : > { %v1893_v59 = vsel %vm1039_vm6, %v1887_v29, %v1889_v38 }
 0x6cb   : > { %v1903_v40 = vsel %vm494_vm0, %v1893_v59, 0 }
 0x6cc   : > { %1924 = vmatpush.bf16.msra.mxu1 %v1903_v40 }
 0x6d1   : > { %v1883_v5 = vpop.permute.xlu0 %1882  ;;  %v1768_v6 = vpop.permute.xlu1 %1767 }
 0x6d2   : > { %v1775_v11 = vsel %vm916_vm8, %v1768_v6, %v1770_v52  ;;  %v1891_v25 = vsel %vm1039_vm6, %v1881_v46, %v1883_v5 }
 0x6d3   : > { %v1784_v33 = vsel %vm494_vm0, %v1775_v11, 0  ;;  %1925 = vmatpush.bf16.msra.mxu1 %v1891_v25 }
 0x6d4   : > { %1795 = vmatpush.bf16.msra.mxu0 %v1784_v33 }
 0x6d6   : > { %2155 = vmatmul.msk.bf16.vlgmr.msra.gmra.mxu1 %vm1779_vm14, %v1871_v20 }
 0x6da   : > { %v1762_v15 = vpop.permute.xlu1 %1761 }
 0x6db   : > { %v1773_v16 = vsel %vm916_vm8, %v1762_v15, %v1764_v44 }
 0x6dc   : > { %1796 = vmatpush.bf16.msra.mxu0 %v1773_v16 }
 0x6df   : > { %2150 = vmatmul.msk.bf16.vlgmr.msra.gmra.mxu0 %vm1779_vm14, %v1757_v14 }
 0x6e2   : > { %v1885_v13 = vpop.permute.xlu1 %1884 }
 0x6e3   : > { %v1892_v54 = vsel %vm1039_vm6, %v1885_v13, %v1887_v29 }
 0x6e4   : > { %v1900_v24 = vsel %vm494_vm0, %v1892_v54, 0 }
 0x6e5   : > { %1911 = vmatpush.bf16.msrb.mxu0 %v1900_v24 }
 0x6ea   : > { %v1879_v55 = vpop.permute.xlu1 %1878 }
 0x6eb   : > { %v1890_v21 = vsel %vm1039_vm6, %v1879_v55, %v1881_v46 }
 0x6ec   : > { %1912 = vmatpush.bf16.msrb.mxu0 %v1890_v21 }
 0x6ee   : > { %v1846_v31 = vpop.f32.mrf.mxu3 }
 0x6ef   : > { %2154 = vmatmul.msk.bf16.vlgmr.msrb.gmra.mxu0 %vm1779_vm14, %v1871_v20 }
 0x6f2   : > { %v1379_v60 = vpop.permute.xlu1 %1378 }
 0x6f3   : > { %v1384_v12 = vadd.f32 %v1379_v60, %v1368_v36  ;;  %v1383_v19 = vadd.f32 %v1379_v60, %v1367_v63 }
 0x6f4   : > { %v1833_v57 = vpop.f32.mrf.mxu2 }
 0x6f6   : > { %v1848_v27 = vpop.f32.mrf.mxu3 }
 0x6fc   : > { %v1835_v0 = vpop.f32.mrf.mxu2 }
 0x743   : > { %v1811_v61 = vpop.f32.mrf.mxu1 }
 0x744   : > { %v1847_v8 = vadd.f32 %v1846_v31, %v1811_v61 }
 0x74b   : > { %v1813_v7 = vpop.f32.mrf.mxu1 }
 0x753   : > { %v1927_v53 = vpop.f32.mrf.mxu1 }
 0x754   : > { %v1932_v41 = vadd.f32 %v1927_v53, %v1847_v8 }
 0x756   : > { %v1940_v56 = vadd.f32 %v1937_v48, %v1932_v41 }
 0x758   : > { %v1942_v23 = vadd.f32 %v1940_v56, %v1384_v12 }
 0x75a   : > { %v1944_v42 = vmax.f32 %v1942_v23, 0.0 }
 0x75b   : > { %v1929_v39 = vpop.f32.mrf.mxu1 }
 0x75c   : > { %v1798_v50 = vpop.f32.mrf.mxu0  ;;  %1946 = vst [vmem:[%s442_s4 + $0x8] sm:$0xff] %v1944_v42 }
 0x75d   : > { %v1834_v45 = vadd.f32 %v1833_v57, %v1798_v50 }
 0x764   : > { %v1800_v47 = vpop.f32.mrf.mxu0 }
 0x76c   : > { %v1914_v2 = vpop.f32.mrf.mxu0 }
 0x76d   : > { %v1931_v49 = vadd.f32 %v1914_v2, %v1834_v45 }
 0x76f   : > { %v1939_v62 = vadd.f32 %v1937_v48, %v1931_v49 }
 0x771   : > { %v1941_v1 = vadd.f32 %v1939_v62, %v1383_v19 }
 0x773   : > { %v1943_v4 = vmax.f32 %v1941_v1, 0.0 }
 0x774   : > { %v1916_v22 = vpop.f32.mrf.mxu0 }
 0x775   : > { %1945 = vst [vmem:[%s442_s4] sm:$0xff] %v1943_v4 }
 0x776   : > { %2439 = shalt.err (!%p2436_p12)
}
 0x777   : > { %2187 = dma.vmem_to_hbm [thread:$0]  (%p2653_p3), %s1962_s27, 256, %s1964_s23, %s1948_s17  }
 0x778 PF: > { %s1975_s25 = sand.u32 1, %s2474_s13   ;;  %p3479_p13 = scmp.ge.s32.totalorder %s2486_s16, 2 }
 0x779   : > { %s1976_s4 = scalar_lea.sflag [#allocation5], %s1975_s25 }
 0x77a   : > { %p2204_p0 = pnand %p3479_p13, %p2600_p6 }
 0x77c   : > { %p2205_p5 = pneg %p2204_p0 }
 0x77e   : > { %2469 = dma.done.wait (%p2205_p5), %s1976_s4, 256  }
 0x77f   : > { %2471 = vsyncadd (%p2205_p5), %s1976_s4, 4294967040  ;;  %s3480_s21 = sld [smem:[#allocation16_spill]]  ;;  %p25_p7 = scmp.ge.s32.totalorder %s2640_s28, 4  }
 0x780   : > { %s3481_s13 = smov %s2478_s14  ;;  %s3482_s14 = smov %s2482_s15 }
 0x781   : > { %s3484_s16 = smov %s2640_s28  ;;  %27 = sbr.rel (!%p25_p7) target bundleno = 11 (0xb), region = 128 }
 0x785   : > { %s3483_s15 = smov %s3480_s21 }
 0x786   :  { %1982 = vsyncpa [#allocation4], 1 }
 0x787   :  { %1984 = vsyncpa [#allocation4 + $0x1], 1 }
 0x788   :  { %1985 = vsyncpa [#allocation7], 1 }
 0x789   :  { %1986 = vsyncpa [#allocation10], 1 }
 0x78a   :  { %1987 = vsyncpa [#allocation5], 1 }
 0x78b   :  { %1989 = vsyncpa [#allocation5 + $0x1], 1 }

</bundles_post_ra>
